<compile_context>
chip_gen: v5e
topology: v5e:2x2
jax: 0.10.0
libtpu: 0.0.40
codegen_flags: <defaults>
</compile_context>

<pallas_src>
import functools

import jax
import jax.numpy as jnp
from jax.experimental import pallas as pl
from jax.experimental.pallas import tpu as pltpu

_LANE = 128
# a @ b.T without materializing b.T (flash-attention "NT" dimension numbers).
_NT_DIMS = (((1,), (1,)), ((), ()))


def _round_up(x, m):
    return ((x + m - 1) // m) * m


def _choose_tile_b(batch, max_tile_b):
    """Batch tile: multiple of 128 (lane-dense output blocks), scaled with the
    batch, and (when the batch is big enough) chosen so the grid has >=2 steps
    for v7x megacore sharding."""
    bp = _round_up(batch, _LANE)
    tb = min(_round_up(max_tile_b, _LANE), bp)
    if tb == bp and bp >= 2 * _LANE:
        tb = _round_up(bp // 2, _LANE)
    return tb


# -----------------------------------------------------------------------------
# Kernel: one batch tile, both nets fused, transposed (lane-dense) outputs.
# -----------------------------------------------------------------------------
def _twinned_kernel(
    s_ref, a_ref,                      # (tb, S) bf16, (tb, A) bf16
    w1s_ref, w1a_ref, b1_ref,          # (S, 2H1) bf16, (A, 2H1) bf16, (1, 2H1) f32
    w2a_ref, b2a_ref,                  # (H1, H2) bf16, (1, H2) f32   -- net1
    w2b_ref, b2b_ref,                  # (H1, H2) bf16, (1, H2) f32   -- net2
    w3t_ref,                           # (2, H2) bf16: row0 = w3a^T, row1 = w3b^T
    b3a_ref, b3b_ref,                  # (1, 1) f32 each
    q1_ref, q2_ref,                    # (1, tb) f32 outputs
    *, h1_dim,
):
    cdt = w1s_ref.dtype                # MXU compute dtype (bf16)

    # Fused layer 1 of both nets (no host-side concat of states/actions):
    # h1 = [states, actions] @ [W1_net1 | W1_net2] -> (tb, 2*H1), f32 accumulate.
    h1 = (
        jnp.dot(s_ref[...], w1s_ref[...], preferred_element_type=jnp.float32)
        + jnp.dot(a_ref[...], w1a_ref[...], preferred_element_type=jnp.float32)
        + b1_ref[...]
    )
    h1 = jnp.maximum(h1, 0.0)
    h1a = h1[:, :h1_dim].astype(cdt)
    h1b = h1[:, h1_dim:].astype(cdt)

    # Layer 2: one [H1, H2] matmul per net (block-diag fusion would double FLOPs).
    h2a = jnp.maximum(
        jnp.dot(h1a, w2a_ref[...], preferred_element_type=jnp.float32) + b2a_ref[...],
        0.0,
    ).astype(cdt)
    h2b = jnp.maximum(
        jnp.dot(h1b, w2b_ref[...], preferred_element_type=jnp.float32) + b2b_ref[...],
        0.0,
    ).astype(cdt)

    # Layer 3, computed transposed so the store is lane-dense:
    #   (2, H2) @ (tb, H2)^T -> (2, tb); row0 of ra = w3a^T . h2a^T = q1^T, etc.
    ra = jax.lax.dot_general(w3t_ref[...], h2a, _NT_DIMS,
                             preferred_element_type=jnp.float32)   # (2, tb)
    rb = jax.lax.dot_general(w3t_ref[...], h2b, _NT_DIMS,
                             preferred_element_type=jnp.float32)   # (2, tb)
    q1_ref[...] = (ra[0:1, :] + b3a_ref[...]).astype(q1_ref.dtype)
    q2_ref[...] = (rb[1:2, :] + b3b_ref[...]).astype(q2_ref.dtype)


def _resident_spec(shape):
    """Full-array block with a constant index_map (stays VMEM-resident)."""
    nd = len(shape)
    return pl.BlockSpec(shape, lambda i, _nd=nd: (0,) * _nd)


# -----------------------------------------------------------------------------
# One-time weight prep (call at parameter-update time, not per forward).
# -----------------------------------------------------------------------------
def fuse_twin_params(params1, params2, state_dim, weight_dtype=jnp.bfloat16):
    w1a, b1a, w2a, b2a, w3a, b3a = params1
    w1b, b1b, w2b, b2b, w3b, b3b = params2

    w1 = jnp.concatenate([w1a, w1b], axis=1)                        # (in, 2*H1)
    w1s = w1[:state_dim].astype(weight_dtype)                       # (S, 2*H1)
    w1ac = w1[state_dim:].astype(weight_dtype)                      # (A, 2*H1)
    b1 = jnp.concatenate([b1a, b1b], axis=1).astype(jnp.float32)    # (1, 2*H1)

    w3t = jnp.concatenate([w3a.T, w3b.T], axis=0).astype(weight_dtype)  # (2, H2)

    return (
        w1s, w1ac, b1,
        w2a.astype(weight_dtype), b2a.astype(jnp.float32),
        w2b.astype(weight_dtype), b2b.astype(jnp.float32),
        w3t,
        b3a.astype(jnp.float32),                                    # (1, 1)
        b3b.astype(jnp.float32),                                    # (1, 1)
    )


# -----------------------------------------------------------------------------
# Forward: equivalent of TwinnedStateActionFunction.forward(states, actions).
# -----------------------------------------------------------------------------
@functools.partial(jax.jit, static_argnames=("max_tile_b",))
def twinned_q(states, actions, fused_params, *, max_tile_b=2048):
    (w1s, w1ac, b1, w2a, b2a, w2b, b2b, w3t, b3a, b3b) = fused_params

    B, S = states.shape
    A = actions.shape[1]
    in_dim = S + A
    H1 = w2a.shape[0]
    H2 = w2a.shape[1]
    cdt = w1s.dtype

    # Inputs travel to the kernel in the MXU compute dtype (halves input DMA).
    s_in = states.astype(cdt)
    a_in = actions.astype(cdt)

    tb = _choose_tile_b(B, max_tile_b)
    grid = (pl.cdiv(B, tb),)           # ragged last block handled by Pallas masking

    weights = (w1s, w1ac, b1, w2a, b2a, w2b, b2b, w3t, b3a, b3b)
    in_specs = [
        pl.BlockSpec((tb, S), lambda i: (i, 0)),
        pl.BlockSpec((tb, A), lambda i: (i, 0)),
    ] + [_resident_spec(w.shape) for w in weights]

    # Lane-dense outputs: (1, B) slabs, block width tb (multiple of 128).
    out_shape = (jax.ShapeDtypeStruct((1, B), jnp.float32),
                 jax.ShapeDtypeStruct((1, B), jnp.float32))
    out_specs = [pl.BlockSpec((1, tb), lambda i: (0, i)),
                 pl.BlockSpec((1, tb), lambda i: (0, i))]

    # Advisory cost estimate for the XLA scheduler.
    flops = 2 * B * (in_dim * 2 * H1 + 2 * H1 * H2 + 2 * H2)
    w_bytes = (in_dim * 2 * H1 + 2 * H1 * H2 + 2 * H2) * 2 \
        + (2 * H1 + 2 * H2 + 2) * 4
    bytes_accessed = w_bytes + B * (S + A) * 2 + 2 * B * 4
    cost = pl.CostEstimate(flops=flops, transcendentals=0,
                           bytes_accessed=bytes_accessed)

    q1, q2 = pl.pallas_call(
        functools.partial(_twinned_kernel, h1_dim=H1),
        out_shape=out_shape,
        grid=grid,
        in_specs=in_specs,
        out_specs=out_specs,
        compiler_params=pltpu.CompilerParams(
            dimension_semantics=("parallel",),       # megacore-shard batch on v7x
            vmem_limit_bytes=40 * 1024 * 1024,       # fits v5e/v6e/v7x for tb<=4096
        ),
        cost_estimate=cost,
    )(s_in, a_in, *weights)

    return q1.reshape(B, 1), q2.reshape(B, 1)


# -----------------------------------------------------------------------------
# Parameter init (mimics torch.nn.Linear default: U(-k, k), k = 1/sqrt(fan_in)).
# Weights stored as [in, out]; biases as [1, out].
# -----------------------------------------------------------------------------
def init_mlp_params(key, in_dim, hidden_units, out_dim):
    dims = [in_dim] + list(hidden_units) + [out_dim]
    params = []
    for i in range(len(dims) - 1):
        fan_in, fan_out = dims[i], dims[i + 1]
        key, kw, kb = jax.random.split(key, 3)
        bound = 1.0 / jnp.sqrt(jnp.float32(fan_in))
        w = jax.random.uniform(kw, (fan_in, fan_out), jnp.float32, -bound, bound)
        b = jax.random.uniform(kb, (1, fan_out), jnp.float32, -bound, bound)
        params += [w, b]
    return params, key


def reference_q(xs, params, compute_dtype=jnp.float32):
    """Plain-JAX reference; compute_dtype mirrors the kernel's MXU input dtype."""
    w1, b1, w2, b2, w3, b3 = params

    def dense(x, w, b):
        return jnp.dot(x.astype(compute_dtype), w.astype(compute_dtype),
                       preferred_element_type=jnp.float32) + b

    h = jnp.maximum(dense(xs, w1, b1), 0.0)
    h = jnp.maximum(dense(h, w2, b2), 0.0)
    return dense(h, w3, b3)


if __name__ == "__main__":
    state_dim = 8
    action_dim = 4
    hidden_units = (256, 256)

    key = jax.random.PRNGKey(0)
    in_dim = state_dim + action_dim
    params1, key = init_mlp_params(key, in_dim, hidden_units, 1)
    params2, key = init_mlp_params(key, in_dim, hidden_units, 1)
    fused = fuse_twin_params(params1, params2, state_dim)

    def run_and_check(key, batch, max_tile_b):
        key, ks, ka = jax.random.split(key, 3)
        states = jax.random.normal(ks, (batch, state_dim), jnp.float32)
        actions = jax.random.normal(ka, (batch, action_dim), jnp.float32)

        q1, q2 = twinned_q(states, actions, fused, max_tile_b=max_tile_b)
        jax.block_until_ready((q1, q2))

        xs = jnp.concatenate([states, actions], axis=-1)
        # Reference with the same bf16 input/weight quantization as the kernel.
        r1 = reference_q(xs, params1, jnp.bfloat16)
        r2 = reference_q(xs, params2, jnp.bfloat16)
        # Full-f32 reference for semantic sanity.
        f1 = reference_q(xs, params1, jnp.float32)
        f2 = reference_q(xs, params2, jnp.float32)

        assert q1.shape == (batch, 1) and q2.shape == (batch, 1)
        assert jnp.allclose(q1, r1, atol=5e-3, rtol=5e-3)
        assert jnp.allclose(q2, r2, atol=5e-3, rtol=5e-3)
        assert jnp.allclose(q1, f1, atol=5e-2, rtol=5e-2)
        assert jnp.allclose(q2, f2, atol=5e-2, rtol=5e-2)
        return key

    # Small demo: single ragged block (B < tile), and a 2-step grid whose last
    # block is ragged (exercises the no-pad path and batch-parallel grid).
    key = run_and_check(key, batch=8, max_tile_b=2048)
    key = run_and_check(key, batch=200, max_tile_b=128)

    print("KERNEL_OK")
</pallas_src>

<mosaic_0001>
module attributes {stable_mosaic.version = 11 : i64} {
  func.func @_twinned_kernel(%arg0: i32, %arg1: memref<128x8xbf16, #tpu.memory_space<vmem>>, %arg2: memref<128x4xbf16, #tpu.memory_space<vmem>>, %arg3: memref<8x512xbf16, #tpu.memory_space<vmem>>, %arg4: memref<4x512xbf16, #tpu.memory_space<vmem>>, %arg5: memref<1x512xf32, #tpu.memory_space<vmem>>, %arg6: memref<256x256xbf16, #tpu.memory_space<vmem>>, %arg7: memref<1x256xf32, #tpu.memory_space<vmem>>, %arg8: memref<256x256xbf16, #tpu.memory_space<vmem>>, %arg9: memref<1x256xf32, #tpu.memory_space<vmem>>, %arg10: memref<2x256xbf16, #tpu.memory_space<vmem>>, %arg11: memref<1x1xf32, #tpu.memory_space<vmem>>, %arg12: memref<1x1xf32, #tpu.memory_space<vmem>>, %arg13: memref<1x128xf32, #tpu.memory_space<vmem>>, %arg14: memref<1x128xf32, #tpu.memory_space<vmem>>) attributes {dimension_semantics = [#tpu.dimension_semantics<parallel>], iteration_bounds = array<i64: 1>, scalar_prefetch = 0 : i64, scratch_operands = 0 : i64, tpu.core_type = #tpu.core_type<tc>, window_params = [{transform_indices = @transform_0, window_bounds = array<i64: 128, 8>}, {transform_indices = @transform_1, window_bounds = array<i64: 128, 4>}, {pipeline_mode = #tpu.pipeline_mode<synchronous>, transform_indices = @transform_2, window_bounds = array<i64: 8, 512>}, {pipeline_mode = #tpu.pipeline_mode<synchronous>, transform_indices = @transform_3, window_bounds = array<i64: 4, 512>}, {pipeline_mode = #tpu.pipeline_mode<synchronous>, transform_indices = @transform_4, window_bounds = array<i64: 1, 512>}, {pipeline_mode = #tpu.pipeline_mode<synchronous>, transform_indices = @transform_5, window_bounds = array<i64: 256, 256>}, {pipeline_mode = #tpu.pipeline_mode<synchronous>, transform_indices = @transform_6, window_bounds = array<i64: 1, 256>}, {pipeline_mode = #tpu.pipeline_mode<synchronous>, transform_indices = @transform_7, window_bounds = array<i64: 256, 256>}, {pipeline_mode = #tpu.pipeline_mode<synchronous>, transform_indices = @transform_8, window_bounds = array<i64: 1, 256>}, {pipeline_mode = #tpu.pipeline_mode<synchronous>, transform_indices = @transform_9, window_bounds = array<i64: 2, 256>}, {pipeline_mode = #tpu.pipeline_mode<synchronous>, transform_indices = @transform_10, window_bounds = array<i64: 1, 1>}, {pipeline_mode = #tpu.pipeline_mode<synchronous>, transform_indices = @transform_11, window_bounds = array<i64: 1, 1>}, {transform_indices = @transform_12, window_bounds = array<i64: 1, 128>}, {transform_indices = @transform_13, window_bounds = array<i64: 1, 128>}]} {
    %c0 = arith.constant 0 : index
    %c0_0 = arith.constant 0 : index
    %0 = vector.load %arg1[%c0, %c0_0] : memref<128x8xbf16, #tpu.memory_space<vmem>>, vector<128x8xbf16>
    %c0_1 = arith.constant 0 : index
    %c0_2 = arith.constant 0 : index
    %1 = vector.load %arg3[%c0_1, %c0_2] : memref<8x512xbf16, #tpu.memory_space<vmem>>, vector<8x512xbf16>
    %cst = arith.constant dense<0.000000e+00> : vector<128x512xf32>
    %2 = tpu.matmul %0, %1, %cst {dimension_numbers = #tpu.dot_dimension_numbers<[1], [0], [0], [1], [0, 0, 1, 1], [], []>} : vector<128x8xbf16>, vector<8x512xbf16>, vector<128x512xf32> -> vector<128x512xf32>
    %c0_3 = arith.constant 0 : index
    %c0_4 = arith.constant 0 : index
    %3 = vector.load %arg2[%c0_3, %c0_4] : memref<128x4xbf16, #tpu.memory_space<vmem>>, vector<128x4xbf16>
    %c0_5 = arith.constant 0 : index
    %c0_6 = arith.constant 0 : index
    %4 = vector.load %arg4[%c0_5, %c0_6] : memref<4x512xbf16, #tpu.memory_space<vmem>>, vector<4x512xbf16>
    %cst_7 = arith.constant dense<0.000000e+00> : vector<128x512xf32>
    %5 = tpu.matmul %3, %4, %cst_7 {dimension_numbers = #tpu.dot_dimension_numbers<[1], [0], [0], [1], [0, 0, 1, 1], [], []>} : vector<128x4xbf16>, vector<4x512xbf16>, vector<128x512xf32> -> vector<128x512xf32>
    %6 = arith.addf %2, %5 : vector<128x512xf32>
    %c0_8 = arith.constant 0 : index
    %c0_9 = arith.constant 0 : index
    %7 = vector.load %arg5[%c0_8, %c0_9] : memref<1x512xf32, #tpu.memory_space<vmem>>, vector<1x512xf32>
    %8 = vector.broadcast %7 : vector<1x512xf32> to vector<128x512xf32>
    %9 = arith.addf %6, %8 : vector<128x512xf32>
    %cst_10 = arith.constant 0.000000e+00 : f32
    %10 = vector.broadcast %cst_10 : f32 to vector<128x512xf32>
    %11 = arith.maximumf %9, %10 : vector<128x512xf32>
    %12 = vector.extract_strided_slice %11 {offsets = [0, 0], sizes = [128, 256], strides = [1, 1]} : vector<128x512xf32> to vector<128x256xf32>
    %13 = arith.truncf %12 : vector<128x256xf32> to vector<128x256xbf16>
    %14 = vector.extract_strided_slice %11 {offsets = [0, 256], sizes = [128, 256], strides = [1, 1]} : vector<128x512xf32> to vector<128x256xf32>
    %15 = arith.truncf %14 : vector<128x256xf32> to vector<128x256xbf16>
    %c0_11 = arith.constant 0 : index
    %c0_12 = arith.constant 0 : index
    %16 = vector.load %arg6[%c0_11, %c0_12] : memref<256x256xbf16, #tpu.memory_space<vmem>>, vector<256x256xbf16>
    %cst_13 = arith.constant dense<0.000000e+00> : vector<128x256xf32>
    %17 = tpu.matmul %13, %16, %cst_13 {dimension_numbers = #tpu.dot_dimension_numbers<[1], [0], [0], [1], [0, 0, 1, 1], [], []>} : vector<128x256xbf16>, vector<256x256xbf16>, vector<128x256xf32> -> vector<128x256xf32>
    %c0_14 = arith.constant 0 : index
    %c0_15 = arith.constant 0 : index
    %18 = vector.load %arg7[%c0_14, %c0_15] : memref<1x256xf32, #tpu.memory_space<vmem>>, vector<1x256xf32>
    %19 = vector.broadcast %18 : vector<1x256xf32> to vector<128x256xf32>
    %20 = arith.addf %17, %19 : vector<128x256xf32>
    %cst_16 = arith.constant 0.000000e+00 : f32
    %21 = vector.broadcast %cst_16 : f32 to vector<128x256xf32>
    %22 = arith.maximumf %20, %21 : vector<128x256xf32>
    %23 = arith.truncf %22 : vector<128x256xf32> to vector<128x256xbf16>
    %c0_17 = arith.constant 0 : index
    %c0_18 = arith.constant 0 : index
    %24 = vector.load %arg8[%c0_17, %c0_18] : memref<256x256xbf16, #tpu.memory_space<vmem>>, vector<256x256xbf16>
    %cst_19 = arith.constant dense<0.000000e+00> : vector<128x256xf32>
    %25 = tpu.matmul %15, %24, %cst_19 {dimension_numbers = #tpu.dot_dimension_numbers<[1], [0], [0], [1], [0, 0, 1, 1], [], []>} : vector<128x256xbf16>, vector<256x256xbf16>, vector<128x256xf32> -> vector<128x256xf32>
    %c0_20 = arith.constant 0 : index
    %c0_21 = arith.constant 0 : index
    %26 = vector.load %arg9[%c0_20, %c0_21] : memref<1x256xf32, #tpu.memory_space<vmem>>, vector<1x256xf32>
    %27 = vector.broadcast %26 : vector<1x256xf32> to vector<128x256xf32>
    %28 = arith.addf %25, %27 : vector<128x256xf32>
    %cst_22 = arith.constant 0.000000e+00 : f32
    %29 = vector.broadcast %cst_22 : f32 to vector<128x256xf32>
    %30 = arith.maximumf %28, %29 : vector<128x256xf32>
    %31 = arith.truncf %30 : vector<128x256xf32> to vector<128x256xbf16>
    %c0_23 = arith.constant 0 : index
    %c0_24 = arith.constant 0 : index
    %32 = vector.load %arg10[%c0_23, %c0_24] : memref<2x256xbf16, #tpu.memory_space<vmem>>, vector<2x256xbf16>
    %cst_25 = arith.constant dense<0.000000e+00> : vector<2x128xf32>
    %33 = tpu.matmul %32, %23, %cst_25 {dimension_numbers = #tpu.dot_dimension_numbers<[1], [1], [0], [0], [0, 0, 1, 0], [], []>} : vector<2x256xbf16>, vector<128x256xbf16>, vector<2x128xf32> -> vector<2x128xf32>
    %c0_26 = arith.constant 0 : index
    %c0_27 = arith.constant 0 : index
    %34 = vector.load %arg10[%c0_26, %c0_27] : memref<2x256xbf16, #tpu.memory_space<vmem>>, vector<2x256xbf16>
    %cst_28 = arith.constant dense<0.000000e+00> : vector<2x128xf32>
    %35 = tpu.matmul %34, %31, %cst_28 {dimension_numbers = #tpu.dot_dimension_numbers<[1], [1], [0], [0], [0, 0, 1, 0], [], []>} : vector<2x256xbf16>, vector<128x256xbf16>, vector<2x128xf32> -> vector<2x128xf32>
    %36 = vector.extract_strided_slice %33 {offsets = [0, 0], sizes = [1, 128], strides = [1, 1]} : vector<2x128xf32> to vector<1x128xf32>
    %c0_29 = arith.constant 0 : index
    %c0_30 = arith.constant 0 : index
    %37 = vector.load %arg11[%c0_29, %c0_30] : memref<1x1xf32, #tpu.memory_space<vmem>>, vector<1x1xf32>
    %38 = vector.broadcast %37 : vector<1x1xf32> to vector<1x128xf32>
    %39 = arith.addf %36, %38 : vector<1x128xf32>
    %c0_31 = arith.constant 0 : index
    %c0_32 = arith.constant 0 : index
    %40 = vector.load %arg13[%c0_31, %c0_32] : memref<1x128xf32, #tpu.memory_space<vmem>>, vector<1x128xf32>
    tpu.vector_store %arg13[%c0_31, %c0_32], %39 {strides = array<i32>} : memref<1x128xf32, #tpu.memory_space<vmem>>, vector<1x128xf32>,
    %41 = vector.extract_strided_slice %35 {offsets = [1, 0], sizes = [1, 128], strides = [1, 1]} : vector<2x128xf32> to vector<1x128xf32>
    %c0_33 = arith.constant 0 : index
    %c0_34 = arith.constant 0 : index
    %42 = vector.load %arg12[%c0_33, %c0_34] : memref<1x1xf32, #tpu.memory_space<vmem>>, vector<1x1xf32>
    %43 = vector.broadcast %42 : vector<1x1xf32> to vector<1x128xf32>
    %44 = arith.addf %41, %43 : vector<1x128xf32>
    %c0_35 = arith.constant 0 : index
    %c0_36 = arith.constant 0 : index
    %45 = vector.load %arg14[%c0_35, %c0_36] : memref<1x128xf32, #tpu.memory_space<vmem>>, vector<1x128xf32>
    tpu.vector_store %arg14[%c0_35, %c0_36], %44 {strides = array<i32>} : memref<1x128xf32, #tpu.memory_space<vmem>>, vector<1x128xf32>,
    return
  }
  func.func @transform_0(%arg0: i32) -> (i32, i32) {
    %c0_i32 = arith.constant 0 : i32
    %c0_i32_0 = arith.constant 0 : i32
    return %arg0, %c0_i32 : i32, i32
  }
  func.func @transform_1(%arg0: i32) -> (i32, i32) {
    %c0_i32 = arith.constant 0 : i32
    %c0_i32_0 = arith.constant 0 : i32
    return %arg0, %c0_i32 : i32, i32
  }
  func.func @transform_2(%arg0: i32) -> (i32, i32) {
    %c0_i32 = arith.constant 0 : i32
    %c0_i32_0 = arith.constant 0 : i32
    %c0_i32_1 = arith.constant 0 : i32
    return %c0_i32, %c0_i32_0 : i32, i32
  }
  func.func @transform_3(%arg0: i32) -> (i32, i32) {
    %c0_i32 = arith.constant 0 : i32
    %c0_i32_0 = arith.constant 0 : i32
    %c0_i32_1 = arith.constant 0 : i32
    return %c0_i32, %c0_i32_0 : i32, i32
  }
  func.func @transform_4(%arg0: i32) -> (i32, i32) {
    %c0_i32 = arith.constant 0 : i32
    %c0_i32_0 = arith.constant 0 : i32
    %c0_i32_1 = arith.constant 0 : i32
    return %c0_i32, %c0_i32_0 : i32, i32
  }
  func.func @transform_5(%arg0: i32) -> (i32, i32) {
    %c0_i32 = arith.constant 0 : i32
    %c0_i32_0 = arith.constant 0 : i32
    %c0_i32_1 = arith.constant 0 : i32
    return %c0_i32, %c0_i32_0 : i32, i32
  }
  func.func @transform_6(%arg0: i32) -> (i32, i32) {
    %c0_i32 = arith.constant 0 : i32
    %c0_i32_0 = arith.constant 0 : i32
    %c0_i32_1 = arith.constant 0 : i32
    return %c0_i32, %c0_i32_0 : i32, i32
  }
  func.func @transform_7(%arg0: i32) -> (i32, i32) {
    %c0_i32 = arith.constant 0 : i32
    %c0_i32_0 = arith.constant 0 : i32
    %c0_i32_1 = arith.constant 0 : i32
    return %c0_i32, %c0_i32_0 : i32, i32
  }
  func.func @transform_8(%arg0: i32) -> (i32, i32) {
    %c0_i32 = arith.constant 0 : i32
    %c0_i32_0 = arith.constant 0 : i32
    %c0_i32_1 = arith.constant 0 : i32
    return %c0_i32, %c0_i32_0 : i32, i32
  }
  func.func @transform_9(%arg0: i32) -> (i32, i32) {
    %c0_i32 = arith.constant 0 : i32
    %c0_i32_0 = arith.constant 0 : i32
    %c0_i32_1 = arith.constant 0 : i32
    return %c0_i32, %c0_i32_0 : i32, i32
  }
  func.func @transform_10(%arg0: i32) -> (i32, i32) {
    %c0_i32 = arith.constant 0 : i32
    %c0_i32_0 = arith.constant 0 : i32
    %c0_i32_1 = arith.constant 0 : i32
    return %c0_i32, %c0_i32_0 : i32, i32
  }
  func.func @transform_11(%arg0: i32) -> (i32, i32) {
    %c0_i32 = arith.constant 0 : i32
    %c0_i32_0 = arith.constant 0 : i32
    %c0_i32_1 = arith.constant 0 : i32
    return %c0_i32, %c0_i32_0 : i32, i32
  }
  func.func @transform_12(%arg0: i32) -> (i32, i32) {
    %c0_i32 = arith.constant 0 : i32
    %c0_i32_0 = arith.constant 0 : i32
    return %c0_i32, %arg0 : i32, i32
  }
  func.func @transform_13(%arg0: i32) -> (i32, i32) {
    %c0_i32 = arith.constant 0 : i32
    %c0_i32_0 = arith.constant 0 : i32
    return %c0_i32, %arg0 : i32, i32
  }
}

</mosaic_0001>

<bundles_post_ra>
// kernel: twinned_q.1
= control target key start
LH: loop header
LB: loop body
LE: loop exit
PB: predicated region body
PF: predicated region fallthrough
CT: control target
= control target key end

     0   :  { %s3198_s0 = inlined_call_operand.vmem [shape: bf16[8,8], index: 0, kind: input, shape index: {}]   ;;  %s3199_s1 = inlined_call_operand.vmem [shape: bf16[8,4], index: 1, kind: input, shape index: {}]   ;;  %s3200_s2 = inlined_call_operand.vmem [shape: bf16[8,512], index: 2, kind: input, shape index: {}]   ;;  %s3201_s3 = inlined_call_operand.vmem [shape: bf16[4,512], index: 3, kind: input, shape index: {}]   ;;  %s3202_s4 = inlined_call_operand.vmem [shape: f32[1,512], index: 4, kind: input, shape index: {}]   ;;  %s3203_s5 = inlined_call_operand.hbm [shape: bf16[256,256], index: 5, kind: input, shape index: {}]   ;;  %s3204_s6 = inlined_call_operand.vmem [shape: f32[1,256], index: 6, kind: input, shape index: {}]   ;;  %s3205_s7 = inlined_call_operand.hbm [shape: bf16[256,256], index: 7, kind: input, shape index: {}]   ;;  %s3206_s8 = inlined_call_operand.vmem [shape: f32[1,256], index: 8, kind: input, shape index: {}]   ;;  %s3207_s9 = inlined_call_operand.vmem [shape: bf16[2,256], index: 9, kind: input, shape index: {}]   ;;  %s3208_s10 = inlined_call_operand.<no memory space> [shape: f32[1,1], index: 10, kind: input, shape index: {}]   ;;  %s3209_s12 = inlined_call_operand.hbm [shape: f32[1,8], index: 12, kind: output, shape index: {0}]   ;;  %s3210_s13 = inlined_call_operand.hbm [shape: f32[1,8], index: 13, kind: output, shape index: {1}]   ;;  %s3211_s11 = inlined_call_operand.<no memory space> [shape: f32[1,1], index: 11, kind: input, shape index: {}]  }
   0x1   :  { %v19_v0 = vstv %s3208_s10  ;;  %v21_v1 = vstv %s3211_s11 }
   0x2   :  { %20 = vst [vmem:[#allocation2] sm:$0x1] %v19_v0 }
   0x3   :  { %22 = vst [vmem:[#allocation3] sm:$0x1] %v21_v1 }
   0x4   :  { %23 = vsyncpa [#allocation5], 0 }
   0x5   :  { %24 = vsyncpa [#allocation8], 0 }
   0x6   :  { %25 = vsyncpa [#allocation6], 0 }
   0x7   :  { %26 = vsyncpa [#allocation11], 0  ;;  %s41_s14 = sshll.u32 %s3203_s5, 4  ;;  %s2423_s15 = smov [#allocation4]   ;;  %s42_s14 = int_to_ptr.hbm [resolvable:$true] %s41_s14 }
   0x8   :  { %s43_s16 = sshll.u32 %s2423_s15, 4  ;;  %s56_s18 = sshll.u32 %s3205_s7, 4  ;;  %s44_s16 = int_to_ptr.vmem [resolvable:$true] %s43_s16  ;;  %s57_s18 = int_to_ptr.hbm [resolvable:$true] %s56_s18 }
   0x9   :  { %s2424_s19 = smov 128   ;;  %s2425_s11 = smov 8  }
   0xa   :  { %49 = dma.hbm_to_vmem [thread:$0]  %s42_s14, 4096, %s44_s16, [#allocation5], %s2424_s19, %s2424_s19, %s2425_s11  }
   0xb   :  { %s2426_s20 = smov [#allocation7]  }
   0xc   :  { %s58_s21 = sshll.u32 %s2426_s20, 4  ;;  %s59_s21 = int_to_ptr.vmem [resolvable:$true] %s58_s21 }
   0xd   :  { %64 = dma.hbm_to_vmem [thread:$0]  %s57_s18, 4096, %s59_s21, [#allocation8], %s2424_s19, %s2424_s19, %s2425_s11  }
   0xe   :  { %2415 = dma.done.wait [#allocation5], 4096  }
   0xf   :  { %2416 = vsyncadd [#allocation5], 4294963200 }
  0x10   :  { %2417 = dma.done.wait [#allocation8], 4096  }
  0x11   :  { %2418 = vsyncadd [#allocation8], 4294963200  ;;  %v116_v2 = vld [vmem:[%s3201_s3] sm:$0xff]  ;;  %vm188_vm0 = vcmask 1041408   ;;  %vm163_vm1 = vcmask 31744   ;;  %v2240_v15 = vld [vmem:[%s3199_s1 + $0x8] sm:$0xff] }
  0x12   :  { %158 = vst [vmem:[#allocation1] ss:$4 sm:$0xff] %v116_v2  ;;  %v1731_v3 = vld [vmem:[%s3207_s9] sm:$0x3]  ;;  %v2241_v16 = vld [vmem:[%s3199_s1 + $0x10] sm:$0xff]  ;;  %v99_v18 = vld [vmem:[%s3200_s2 + $0x8] sm:$0xff] }
  0x13   :  { %v2239_v9 = vld [vmem:[%s3199_s1] sm:$0xff]  ;;  %v437_v21 = vunpack.c.l.b16 %v99_v18  ;;  %vm468_vm2 = vcmask 1043456   ;;  %v2242_v28 = vld [vmem:[%s3199_s1 + $0x18] sm:$0xff]  ;;  %v438_v29 = vunpack.c.h.b16 %v99_v18  ;;  %v2244_v33 = vld [vmem:[%s3199_s1 + $0x28] sm:$0xff]  ;;  %vm443_vm3 = vcmask 64512   ;;  %s1820_s11 = sshll.u32 %s3209_s12, 4  ;;  %s1821_s11 = int_to_ptr.hbm [resolvable:$true] %s1820_s11 }
  0x14   :  { %v98_v17 = vld [vmem:[%s3200_s2] sm:$0xff]  ;;  %v2245_v34 = vld [vmem:[%s3199_s1 + $0x30] sm:$0xff]  ;;  %v2246_v35 = vld [vmem:[%s3199_s1 + $0x38] sm:$0xff]  ;;  %s2429_s20 = smov [#allocation10]  }
  0x15   :  { %v435_v19 = vunpack.c.l.b16 %v98_v17  ;;  %v436_v20 = vunpack.c.h.b16 %v98_v17  ;;  %v441_v24 = vpack.c.b16 %v437_v21, %v437_v21  ;;  %v442_v30 = vpack.c.b16 %v438_v29, %v438_v29  ;;  %v2243_v32 = vld [vmem:[%s3199_s1 + $0x20] sm:$0xff]  ;;  %v2232_v44 = vld [vmem:[%s3198_s0 + $0x8] sm:$0xff]  ;;  %v2233_v53 = vld [vmem:[%s3198_s0 + $0x10] sm:$0xff]  ;;  %s1829_s21 = sshll.u32 %s2429_s20, 4  ;;  %s1831_s1 = sshll.u32 %s3210_s13, 4  ;;  %s1830_s21 = int_to_ptr.vmem [resolvable:$true] %s1829_s21  ;;  %s1832_s1 = int_to_ptr.hbm [resolvable:$true] %s1831_s1 }
  0x16   :  { %v2231_v36 = vld [vmem:[%s3198_s0] sm:$0xff]  ;;  %v2234_v62 = vld [vmem:[%s3198_s0 + $0x18] sm:$0xff] }
  0x17   :  { %v439_v22 = vpack.c.b16 %v435_v19, %v435_v19  ;;  %v440_v23 = vpack.c.b16 %v436_v20, %v436_v20  ;;  %v476_v27 = vsel %vm468_vm2, %v441_v24, 0  ;;  %v479_v31 = vsel %vm468_vm2, %v442_v30, 0  ;;  %v2261_v2 = vld [vmem:[#allocation4 + $0x74] sm:$0xf]  ;;  %v2278_v18 = vld [vmem:[#allocation4 + $0xf4] sm:$0xf0] }
  0x18   :  { %v2235_v21 = vld [vmem:[%s3198_s0 + $0x20] sm:$0xff]  ;;  %v2091_v29 = vld [vmem:[#allocation4 + $0xe8] sm:$0xf0] }
  0x19   :  { %v159_v4 = vld.sshfl [vmem:[#allocation1] sm:$0xff pattern:$0x73625140]  ;;  %v160_v5 = vld.sshfl [vmem:[#allocation1 + $0x8] sm:$0xff pattern:$0x73625140] }
  0x1a   :  { %v189_v6 = vsel %vm188_vm0, %v159_v4, 0  ;;  %v191_v7 = vsel %vm188_vm0, %v160_v5, 0  ;;  %v161_v8 = vld.sshfl [vmem:[#allocation1 + $0x10] sm:$0xff pattern:$0x73625140]  ;;  %v470_v25 = vsel %vm468_vm2, %v439_v22, 0 }
  0x1b   :  { %204 = vmatpush.bf16.msra.mxu0 %v189_v6  ;;  %253 = vmatpush.bf16.msra.mxu1 %v191_v7  ;;  %v193_v10 = vsel %vm188_vm0, %v161_v8, 0  ;;  %v162_v11 = vld.sshfl [vmem:[#allocation1 + $0x18] sm:$0xff pattern:$0x73625140]  ;;  %v473_v26 = vsel %vm468_vm2, %v440_v23, 0 }
  0x1c   :  { %302 = vmatpush.bf16.msra.mxu2 %v193_v10  ;;  %v195_v12 = vsel %vm188_vm0, %v162_v11, 0  ;;  %1733 = vst [vmem:[#allocation1] ss:$9 sm:$0xff] %v1731_v3  ;;  %v2277_v5 = vld [vmem:[#allocation4 + $0xf4] sm:$0xf] }
  0x1d   :  { %351 = vmatpush.bf16.msra.mxu3 %v195_v12  ;;  %v2099_v6 = vld [vmem:[#allocation4 + $0xf8] sm:$0xf0]  ;;  %v2033_v12 = vld [vmem:[#allocation4 + $0x70] sm:$0xf] }
  0x1e   :  { %1879 = vmatmul.msk.bf16.vlgmr.msra.gmra.mxu0 %vm163_vm1, %v2239_v9  ;;  %1887 = vmatmul.msk.bf16.vlgmr.msra.gmra.mxu1 %vm163_vm1, %v2239_v9  ;;  %v2102_v7 = vor.u32 %v2277_v5, %v2099_v6 }
  0x1f   :  { %1895 = vmatmul.msk.bf16.vlgmr.msra.gmra.mxu2 %vm163_vm1, %v2239_v9  ;;  %488 = vmatpush.bf16.msrb.mxu0 %v470_v25  ;;  %v2259_v25 = vld [vmem:[#allocation4 + $0x64] sm:$0xf] }
  0x20   :  { %1903 = vmatmul.msk.bf16.vlgmr.msra.gmra.mxu3 %vm163_vm1, %v2239_v9  ;;  %537 = vmatpush.bf16.msrb.mxu1 %v473_v26  ;;  %v2027_v26 = vld [vmem:[#allocation4 + $0x68] sm:$0xf0] }
  0x21   :  { %586 = vmatpush.bf16.msrb.mxu2 %v476_v27  ;;  %635 = vmatpush.bf16.msrb.mxu3 %v479_v31  ;;  %v2030_v27 = vor.u32 %v2259_v25, %v2027_v26 }
  0x23   :  { %v2525_v13 = vld [vmem:[#allocation1] sm:$0xff]  ;;  %v2527_v14 = vld [vmem:[#allocation1 + $0x9] sm:$0xff] }
  0x24   :  { %3212 = vst [vmem:[#allocation16_spill] sm:$0xff] %v2525_v13 }
  0x25   :  { %3213 = vst [vmem:[#allocation17_spill] sm:$0xff] %v2527_v14  ;;  %1192 = vmatpush.bf16.msra.mxu3 %v2102_v7 }
  0x26   :  { %1764 = vst [vmem:[#allocation1] ss:$9 sm:$0xff] %v1731_v3  ;;  %v2035_v3 = vld [vmem:[#allocation4 + $0x78] sm:$0xf0] }
  0x27   :  { %v2038_v4 = vor.u32 %v2261_v2, %v2035_v3 }
  0x29   :  { %1143 = vmatpush.bf16.msra.mxu2 %v2038_v4  ;;  %v2236_v4 = vld [vmem:[%s3198_s0 + $0x28] sm:$0xff] }
  0x2d   :  { %1144 = vmatpush.bf16.msra.mxu2 %v2030_v27 }
  0x2e   :  { %1880 = vmatmul.msk.bf16.gmra.mxu0 %vm163_vm1, %v2240_v15  ;;  %1888 = vmatmul.msk.bf16.gmra.mxu1 %vm163_vm1, %v2240_v15 }
  0x2f   :  { %1896 = vmatmul.msk.bf16.gmra.mxu2 %vm163_vm1, %v2240_v15 }
  0x30   :  { %1904 = vmatmul.msk.bf16.gmra.mxu3 %vm163_vm1, %v2240_v15  ;;  %v2262_v15 = vld [vmem:[#allocation4 + $0x74] sm:$0xf0] }
  0x31   :  { %v2034_v17 = vor.u32 %v2262_v15, %v2033_v12  ;;  %v2257_v12 = vld [vmem:[#allocation4 + $0x54] sm:$0xf]  ;;  %v2019_v15 = vld [vmem:[#allocation4 + $0x58] sm:$0xf0] }
  0x33   :  { %1045 = vmatpush.bf16.msra.mxu0 %v2034_v17  ;;  %v2273_v17 = vld [vmem:[#allocation4 + $0xd4] sm:$0xf] }
  0x3e   :  { %1881 = vmatmul.msk.bf16.gmra.mxu0 %vm163_vm1, %v2241_v16  ;;  %1889 = vmatmul.msk.bf16.gmra.mxu1 %vm163_vm1, %v2241_v16 }
  0x3f   :  { %1897 = vmatmul.msk.bf16.gmra.mxu2 %vm163_vm1, %v2241_v16 }
  0x40   :  { %1905 = vmatmul.msk.bf16.gmra.mxu3 %vm163_vm1, %v2241_v16  ;;  %v2097_v16 = vld [vmem:[#allocation4 + $0xf0] sm:$0xf] }
  0x41   :  { %v2098_v19 = vor.u32 %v2278_v18, %v2097_v16  ;;  %v2022_v16 = vor.u32 %v2257_v12, %v2019_v15  ;;  %v2083_v18 = vld [vmem:[#allocation4 + $0xd8] sm:$0xf0]  ;;  %v2272_v12 = vld [vmem:[#allocation4 + $0xc4] sm:$0xf0]  ;;  %v2255_v15 = vld [vmem:[#allocation4 + $0x44] sm:$0xf] }
  0x43   :  { %1094 = vmatpush.bf16.msra.mxu1 %v2098_v19  ;;  %1145 = vmatpush.bf16.msra.mxu2 %v2022_v16  ;;  %v2086_v19 = vor.u32 %v2273_v17, %v2083_v18  ;;  %v2011_v16 = vld [vmem:[#allocation4 + $0x48] sm:$0xf0] }
  0x44   :  { %v2237_v18 = vld [vmem:[%s3198_s0 + $0x30] sm:$0xff]  ;;  %v2014_v14 = vor.u32 %v2255_v15, %v2011_v16  ;;  %v2003_v15 = vld [vmem:[#allocation4 + $0x38] sm:$0xf0]  ;;  %v2269_v16 = vld [vmem:[#allocation4 + $0xb4] sm:$0xf] }
  0x47   :  { %1146 = vmatpush.bf16.msra.mxu2 %v2014_v14 }
  0x4e   :  { %1882 = vmatmul.msk.bf16.gmra.mxu0 %vm163_vm1, %v2242_v28  ;;  %1890 = vmatmul.msk.bf16.gmra.mxu1 %vm163_vm1, %v2242_v28 }
  0x4f   :  { %1898 = vmatmul.msk.bf16.gmra.mxu2 %vm163_vm1, %v2242_v28 }
  0x50   :  { %1906 = vmatmul.msk.bf16.gmra.mxu3 %vm163_vm1, %v2242_v28  ;;  %v2275_v28 = vld [vmem:[#allocation4 + $0xe4] sm:$0xf] }
  0x51   :  { %v2094_v30 = vor.u32 %v2275_v28, %v2091_v29  ;;  %v2017_v28 = vld [vmem:[#allocation4 + $0x50] sm:$0xf]  ;;  %v2258_v29 = vld [vmem:[#allocation4 + $0x54] sm:$0xf0] }
  0x53   :  { %1193 = vmatpush.bf16.msra.mxu3 %v2094_v30  ;;  %v2081_v30 = vld [vmem:[#allocation4 + $0xd0] sm:$0xf] }
  0x57   :  { %1194 = vmatpush.bf16.msra.mxu3 %v2086_v19 }
  0x5e   :  { %1883 = vmatmul.msk.bf16.gmra.mxu0 %vm163_vm1, %v2243_v32  ;;  %1891 = vmatmul.msk.bf16.gmra.mxu1 %vm163_vm1, %v2243_v32 }
  0x5f   :  { %1899 = vmatmul.msk.bf16.gmra.mxu2 %vm163_vm1, %v2243_v32 }
  0x60   :  { %1907 = vmatmul.msk.bf16.gmra.mxu3 %vm163_vm1, %v2243_v32 }
  0x6e   :  { %1884 = vmatmul.msk.bf16.gmra.mxu0 %vm163_vm1, %v2244_v33  ;;  %1892 = vmatmul.msk.bf16.gmra.mxu1 %vm163_vm1, %v2244_v33 }
  0x6f   :  { %1900 = vmatmul.msk.bf16.gmra.mxu2 %vm163_vm1, %v2244_v33 }
  0x70   :  { %1908 = vmatmul.msk.bf16.gmra.mxu3 %vm163_vm1, %v2244_v33 }
  0x7e   :  { %1885 = vmatmul.msk.bf16.gmra.mxu0 %vm163_vm1, %v2245_v34  ;;  %1893 = vmatmul.msk.bf16.gmra.mxu1 %vm163_vm1, %v2245_v34 }
  0x7f   :  { %1901 = vmatmul.msk.bf16.gmra.mxu2 %vm163_vm1, %v2245_v34 }
  0x80   :  { %1909 = vmatmul.msk.bf16.gmra.mxu3 %vm163_vm1, %v2245_v34 }
  0x8e   :  { %1886 = vmatmul.msk.bf16.gmra.mxu0 %vm163_vm1, %v2246_v35  ;;  %1894 = vmatmul.msk.bf16.gmra.mxu1 %vm163_vm1, %v2246_v35 }
  0x8f   :  { %1902 = vmatmul.msk.bf16.gmra.mxu2 %vm163_vm1, %v2246_v35 }
  0x90   :  { %1910 = vmatmul.msk.bf16.gmra.mxu3 %vm163_vm1, %v2246_v35  ;;  %v2025_v35 = vld [vmem:[#allocation4 + $0x60] sm:$0xf] }
  0x9b   :  { %v2591_v37 = vpop.f32.mrf.mxu0  ;;  %v2593_v38 = vpop.f32.mrf.mxu1 }
  0x9e   :  { %1943 = vmatmul.msk.bf16.vlgmr.msrb.gmra.mxu0 %vm443_vm3, %v2231_v36  ;;  %1951 = vmatmul.msk.bf16.vlgmr.msrb.gmra.mxu1 %vm443_vm3, %v2231_v36 }
  0x9f   :  { %1959 = vmatmul.msk.bf16.vlgmr.msrb.gmra.mxu2 %vm443_vm3, %v2231_v36 }
  0xa0   :  { %1967 = vmatmul.msk.bf16.vlgmr.msrb.gmra.mxu3 %vm443_vm3, %v2231_v36  ;;  %v2260_v36 = vld [vmem:[#allocation4 + $0x64] sm:$0xf0] }
  0xa2   :  { %v2599_v39 = vpop.f32.mrf.mxu2 }
  0xa3   :  { %v2601_v40 = vpop.f32.mrf.mxu3  ;;  %v2603_v41 = vpop.f32.mrf.mxu0 }
  0xa4   :  { %v2605_v42 = vpop.f32.mrf.mxu1 }
  0xaa   :  { %v2607_v43 = vpop.f32.mrf.mxu2 }
  0xab   :  { %v2612_v45 = vpop.f32.mrf.mxu3  ;;  %v2614_v46 = vpop.f32.mrf.mxu0 }
  0xac   :  { %v2616_v47 = vpop.f32.mrf.mxu1 }
  0xae   :  { %1944 = vmatmul.msk.bf16.gmra.mxu0 %vm443_vm3, %v2232_v44  ;;  %1952 = vmatmul.msk.bf16.gmra.mxu1 %vm443_vm3, %v2232_v44 }
  0xaf   :  { %1960 = vmatmul.msk.bf16.gmra.mxu2 %vm443_vm3, %v2232_v44 }
  0xb0   :  { %1968 = vmatmul.msk.bf16.gmra.mxu3 %vm443_vm3, %v2232_v44  ;;  %v2089_v44 = vld [vmem:[#allocation4 + $0xe0] sm:$0xf] }
  0xb2   :  { %v2622_v48 = vpop.f32.mrf.mxu2 }
  0xb3   :  { %v2624_v49 = vpop.f32.mrf.mxu3  ;;  %v2626_v50 = vpop.f32.mrf.mxu0 }
  0xb4   :  { %v2628_v51 = vpop.f32.mrf.mxu1 }
  0xba   :  { %v2630_v52 = vpop.f32.mrf.mxu2 }
  0xbb   :  { %v2635_v54 = vpop.f32.mrf.mxu3  ;;  %v2637_v55 = vpop.f32.mrf.mxu0 }
  0xbc   :  { %v2639_v56 = vpop.f32.mrf.mxu1 }
  0xbe   :  { %1945 = vmatmul.msk.bf16.gmra.mxu0 %vm443_vm3, %v2233_v53  ;;  %1953 = vmatmul.msk.bf16.gmra.mxu1 %vm443_vm3, %v2233_v53 }
  0xbf   :  { %1961 = vmatmul.msk.bf16.gmra.mxu2 %vm443_vm3, %v2233_v53 }
  0xc0   :  { %1969 = vmatmul.msk.bf16.gmra.mxu3 %vm443_vm3, %v2233_v53  ;;  %v2026_v53 = vor.u32 %v2260_v36, %v2025_v35  ;;  %v2018_v35 = vor.u32 %v2258_v29, %v2017_v28  ;;  %v2274_v36 = vld [vmem:[#allocation4 + $0xd4] sm:$0xf0]  ;;  %v2271_v28 = vld [vmem:[#allocation4 + $0xc4] sm:$0xf]  ;;  %v2075_v29 = vld [vmem:[#allocation4 + $0xc8] sm:$0xf0] }
  0xc2   :  { %v2645_v57 = vpop.f32.mrf.mxu2  ;;  %1046 = vmatpush.bf16.msra.mxu0 %v2026_v53  ;;  %v2009_v53 = vld [vmem:[#allocation4 + $0x40] sm:$0xf] }
  0xc3   :  { %v2647_v58 = vpop.f32.mrf.mxu3  ;;  %v2649_v59 = vpop.f32.mrf.mxu0 }
  0xc4   :  { %v2651_v60 = vpop.f32.mrf.mxu1 }
  0xc6   :  { %1047 = vmatpush.bf16.msra.mxu0 %v2018_v35 }
  0xca   :  { %v2653_v61 = vpop.f32.mrf.mxu2 }
  0xcb   :  { %v2658_v63 = vpop.f32.mrf.mxu3  ;;  %v2660_v0 = vpop.f32.mrf.mxu0 }
  0xcc   :  { %v2662_v1 = vpop.f32.mrf.mxu1 }
  0xce   :  { %1946 = vmatmul.msk.bf16.gmra.mxu0 %vm443_vm3, %v2234_v62  ;;  %1954 = vmatmul.msk.bf16.gmra.mxu1 %vm443_vm3, %v2234_v62 }
  0xcf   :  { %1962 = vmatmul.msk.bf16.gmra.mxu2 %vm443_vm3, %v2234_v62 }
  0xd0   :  { %1970 = vmatmul.msk.bf16.gmra.mxu3 %vm443_vm3, %v2234_v62  ;;  %v2276_v62 = vld [vmem:[#allocation4 + $0xe4] sm:$0xf0] }
  0xd1   :  { %v2090_v2 = vor.u32 %v2276_v62, %v2089_v44  ;;  %v2082_v44 = vor.u32 %v2274_v36, %v2081_v30  ;;  %v2256_v62 = vld [vmem:[#allocation4 + $0x44] sm:$0xf0]  ;;  %v2078_v36 = vor.u32 %v2271_v28, %v2075_v29  ;;  %v1993_v28 = vld [vmem:[#allocation4 + $0x20] sm:$0xf] }
  0xd2   :  { %v2668_v8 = vpop.f32.mrf.mxu2  ;;  %v2252_v29 = vld [vmem:[#allocation4 + $0x24] sm:$0xf0] }
  0xd3   :  { %3214 = vst [vmem:[#allocation18_spill] sm:$0xff] %v2668_v8  ;;  %v2670_v9 = vpop.f32.mrf.mxu3  ;;  %v2672_v10 = vpop.f32.mrf.mxu0  ;;  %1095 = vmatpush.bf16.msra.mxu1 %v2090_v2  ;;  %v2073_v2 = vld [vmem:[#allocation4 + $0xc0] sm:$0xf]  ;;  %1195 = vmatpush.bf16.msra.mxu3 %v2078_v36 }
  0xd4   :  { %3215 = vst [vmem:[#allocation19_spill] sm:$0xff] %v2670_v9  ;;  %v2674_v11 = vpop.f32.mrf.mxu1  ;;  %v2074_v19 = vor.u32 %v2272_v12, %v2073_v2  ;;  %v2253_v12 = vld [vmem:[#allocation4 + $0x34] sm:$0xf]  ;;  %v2057_v36 = vld [vmem:[#allocation4 + $0xa0] sm:$0xf] }
  0xd7   :  { %1096 = vmatpush.bf16.msra.mxu1 %v2082_v44 }
  0xda   :  { %v2676_v20 = vpop.f32.mrf.mxu2 }
  0xdb   :  { %3216 = vst [vmem:[#allocation20_spill] sm:$0xff] %v2676_v20  ;;  %v2681_v22 = vpop.f32.mrf.mxu3  ;;  %v2683_v23 = vpop.f32.mrf.mxu0  ;;  %1097 = vmatpush.bf16.msra.mxu1 %v2074_v19  ;;  %v2067_v19 = vld [vmem:[#allocation4 + $0xb8] sm:$0xf0] }
  0xdc   :  { %3217 = vst [vmem:[#allocation21_spill] sm:$0xff] %v2681_v22  ;;  %v2685_v24 = vpop.f32.mrf.mxu1  ;;  %v2070_v14 = vor.u32 %v2269_v16, %v2067_v19  ;;  %v2250_v19 = vld [vmem:[#allocation4 + $0x14] sm:$0xf0] }
  0xde   :  { %1947 = vmatmul.msk.bf16.gmra.mxu0 %vm443_vm3, %v2235_v21  ;;  %1955 = vmatmul.msk.bf16.gmra.mxu1 %vm443_vm3, %v2235_v21 }
  0xdf   :  { %1963 = vmatmul.msk.bf16.gmra.mxu2 %vm443_vm3, %v2235_v21  ;;  %1196 = vmatpush.bf16.msra.mxu3 %v2070_v14  ;;  %v2249_v14 = vld [vmem:[#allocation4 + $0x14] sm:$0xf] }
  0xe0   :  { %1971 = vmatmul.msk.bf16.gmra.mxu3 %vm443_vm3, %v2235_v21 }
  0xe2   :  { %v2691_v31 = vpop.f32.mrf.mxu2 }
  0xe3   :  { %3218 = vst [vmem:[#allocation22_spill] sm:$0xff] %v2691_v31  ;;  %v2693_v32 = vpop.f32.mrf.mxu3  ;;  %v2695_v33 = vpop.f32.mrf.mxu0 }
  0xe4   :  { %3219 = vst [vmem:[#allocation23_spill] sm:$0xff] %v2693_v32  ;;  %v2697_v34 = vpop.f32.mrf.mxu1 }
  0xea   :  { %v2699_v3 = vpop.f32.mrf.mxu2 }
  0xeb   :  { %3220 = vst [vmem:[#allocation24_spill] sm:$0xff] %v2699_v3  ;;  %v2704_v5 = vpop.f32.mrf.mxu3  ;;  %v2706_v6 = vpop.f32.mrf.mxu0 }
  0xec   :  { %3221 = vst [vmem:[#allocation25_spill] sm:$0xff] %v2704_v5  ;;  %v2708_v7 = vpop.f32.mrf.mxu1  ;;  %v2264_v5 = vld [vmem:[#allocation4 + $0x84] sm:$0xf0] }
  0xee   :  { %1948 = vmatmul.msk.bf16.gmra.mxu0 %vm443_vm3, %v2236_v4  ;;  %1956 = vmatmul.msk.bf16.gmra.mxu1 %vm443_vm3, %v2236_v4 }
  0xef   :  { %1964 = vmatmul.msk.bf16.gmra.mxu2 %vm443_vm3, %v2236_v4 }
  0xf0   :  { %1972 = vmatmul.msk.bf16.gmra.mxu3 %vm443_vm3, %v2236_v4  ;;  %v2010_v4 = vor.u32 %v2256_v62, %v2009_v53  ;;  %v2001_v53 = vld [vmem:[#allocation4 + $0x30] sm:$0xf]  ;;  %v2254_v62 = vld [vmem:[#allocation4 + $0x34] sm:$0xf0] }
  0xf1   :  { %v2002_v13 = vor.u32 %v2254_v62, %v2001_v53  ;;  %v1994_v53 = vor.u32 %v2252_v29, %v1993_v28  ;;  %v2268_v62 = vld [vmem:[#allocation4 + $0xa4] sm:$0xf0]  ;;  %v2049_v29 = vld [vmem:[#allocation4 + $0x90] sm:$0xf] }
  0xf2   :  { %v2714_v21 = vpop.f32.mrf.mxu2  ;;  %1048 = vmatpush.bf16.msra.mxu0 %v2010_v4  ;;  %v2006_v4 = vor.u32 %v2253_v12, %v2003_v15  ;;  %v2267_v12 = vld [vmem:[#allocation4 + $0xa4] sm:$0xf]  ;;  %v2059_v15 = vld [vmem:[#allocation4 + $0xa8] sm:$0xf0] }
  0xf3   :  { %3222 = vst [vmem:[#allocation26_spill] sm:$0xff] %v2714_v21  ;;  %v2716_v25 = vpop.f32.mrf.mxu3  ;;  %v2718_v26 = vpop.f32.mrf.mxu0  ;;  %v2270_v21 = vld [vmem:[#allocation4 + $0xb4] sm:$0xf0] }
  0xf4   :  { %3223 = vst [vmem:[#allocation27_spill] sm:$0xff] %v2716_v25  ;;  %v2720_v27 = vpop.f32.mrf.mxu1  ;;  %v2065_v25 = vld [vmem:[#allocation4 + $0xb0] sm:$0xf]  ;;  %1147 = vmatpush.bf16.msra.mxu2 %v2006_v4 }
  0xf5   :  { %v2066_v2 = vor.u32 %v2270_v21, %v2065_v25  ;;  %v1995_v21 = vld [vmem:[#allocation4 + $0x28] sm:$0xf0]  ;;  %v1985_v4 = vld [vmem:[#allocation4 + $0x10] sm:$0xf] }
  0xf6   :  { %1049 = vmatpush.bf16.msra.mxu0 %v2002_v13  ;;  %v1986_v28 = vor.u32 %v2250_v19, %v1985_v4  ;;  %v1979_v4 = vld [vmem:[#allocation4 + $0x8] sm:$0xf0] }
  0xf7   :  { %1098 = vmatpush.bf16.msra.mxu1 %v2066_v2  ;;  %v2062_v2 = vor.u32 %v2267_v12, %v2059_v15  ;;  %v2248_v12 = vld [vmem:[#allocation4 + $0x4] sm:$0xf0]  ;;  %v2041_v15 = vld [vmem:[#allocation4 + $0x80] sm:$0xf] }
  0xf9   :  { %1197 = vmatpush.bf16.msra.mxu3 %v2062_v2  ;;  %v2042_v2 = vor.u32 %v2264_v5, %v2041_v15 }
  0xfa   :  { %v2722_v17 = vpop.f32.mrf.mxu2  ;;  %1050 = vmatpush.bf16.msra.mxu0 %v1994_v53  ;;  %v1977_v53 = vld [vmem:[#allocation4] sm:$0xf] }
  0xfb   :  { %3224 = vst [vmem:[#allocation28_spill] sm:$0xff] %v2722_v17  ;;  %v2727_v30 = vpop.f32.mrf.mxu3  ;;  %v2729_v35 = vpop.f32.mrf.mxu0  ;;  %v2058_v17 = vor.u32 %v2268_v62, %v2057_v36  ;;  %v1987_v36 = vld [vmem:[#allocation4 + $0x18] sm:$0xf0]  ;;  %v2265_v62 = vld [vmem:[#allocation4 + $0x94] sm:$0xf] }
  0xfc   :  { %3225 = vst [vmem:[#allocation29_spill] sm:$0xff] %v2727_v30  ;;  %v2731_v44 = vpop.f32.mrf.mxu1  ;;  %v2251_v30 = vld [vmem:[#allocation4 + $0x24] sm:$0xf] }
  0xfd   :  { %v1998_v13 = vor.u32 %v2251_v30, %v1995_v21  ;;  %1099 = vmatpush.bf16.msra.mxu1 %v2058_v17  ;;  %v2051_v21 = vld [vmem:[#allocation4 + $0x98] sm:$0xf0]  ;;  %v1978_v17 = vor.u32 %v2248_v12, %v1977_v53 }
  0xfe   :  { %1949 = vmatmul.msk.bf16.gmra.mxu0 %vm443_vm3, %v2237_v18  ;;  %1957 = vmatmul.msk.bf16.gmra.mxu1 %vm443_vm3, %v2237_v18  ;;  %v2054_v31 = vor.u32 %v2265_v62, %v2051_v21 }
  0xff   :  { %1965 = vmatmul.msk.bf16.gmra.mxu2 %vm443_vm3, %v2237_v18  ;;  %1051 = vmatpush.bf16.msra.mxu0 %v1986_v28 }
 0x100   :  { %1973 = vmatmul.msk.bf16.gmra.mxu3 %vm443_vm3, %v2237_v18  ;;  %1148 = vmatpush.bf16.msra.mxu2 %v1998_v13  ;;  %v2247_v13 = vld [vmem:[#allocation4 + $0x4] sm:$0xf] }
 0x101   :  { %1198 = vmatpush.bf16.msra.mxu3 %v2054_v31  ;;  %v1982_v28 = vor.u32 %v2247_v13, %v1979_v4  ;;  %v2775_v4 = vld [vmem:[%s3202_s4] sm:$0xf] }
 0x102   :  { %v2737_v25 = vpop.f32.mrf.mxu2 }
 0x103   :  { %3226 = vst [vmem:[#allocation30_spill] sm:$0xff] %v2737_v25  ;;  %v2739_v32 = vpop.f32.mrf.mxu3  ;;  %v2741_v18 = vpop.f32.mrf.mxu0  ;;  %v2266_v25 = vld [vmem:[#allocation4 + $0x94] sm:$0xf0]  ;;  %1052 = vmatpush.bf16.msra.mxu0 %v1978_v17 }
 0x104   :  { %3227 = vst [vmem:[#allocation31_spill] sm:$0xff] %v2739_v32  ;;  %v2743_v16 = vpop.f32.mrf.mxu1  ;;  %v2050_v30 = vor.u32 %v2266_v25, %v2049_v29  ;;  %v1990_v32 = vor.u32 %v2249_v14, %v1987_v36  ;;  %v2238_v25 = vld [vmem:[%s3198_s0 + $0x38] sm:$0xff]  ;;  %v2263_v29 = vld [vmem:[#allocation4 + $0x84] sm:$0xf] }
 0x105   :  { %v2043_v14 = vld [vmem:[#allocation4 + $0x88] sm:$0xf0] }
 0x106   :  { %1100 = vmatpush.bf16.msra.mxu1 %v2050_v30  ;;  %1149 = vmatpush.bf16.msra.mxu2 %v1990_v32  ;;  %v2046_v32 = vor.u32 %v2263_v29, %v2043_v14  ;;  %v2783_v29 = vperm.slane %v2775_v4, 1 }
 0x108   :  { %1199 = vmatpush.bf16.msra.mxu3 %v2046_v32 }
 0x10a   :  { %v2745_v19 = vpop.f32.mrf.mxu2  ;;  %1101 = vmatpush.bf16.msra.mxu1 %v2042_v2  ;;  %1150 = vmatpush.bf16.msra.mxu2 %v1982_v28  ;;  %v2779_v2 = vperm.slane %v2775_v4, 0 }
 0x10b   :  { %3228 = vst [vmem:[#allocation32_spill] sm:$0xff] %v2745_v19  ;;  %v2750_v30 = vpop.f32.mrf.mxu3  ;;  %v2752_v36 = vpop.f32.mrf.mxu0 }
 0x10c   :  { %3229 = vst [vmem:[#allocation33_spill] sm:$0xff] %v2750_v30  ;;  %v2754_v62 = vpop.f32.mrf.mxu1 }
 0x10e   :  { %1950 = vmatmul.msk.bf16.gmra.mxu0 %vm443_vm3, %v2238_v25  ;;  %1958 = vmatmul.msk.bf16.gmra.mxu1 %vm443_vm3, %v2238_v25 }
 0x10f   :  { %1966 = vmatmul.msk.bf16.gmra.mxu2 %vm443_vm3, %v2238_v25 }
 0x110   :  { %1974 = vmatmul.msk.bf16.gmra.mxu3 %vm443_vm3, %v2238_v25 }
 0x112   :  { %v2760_v31 = vpop.f32.mrf.mxu2 }
 0x113   :  { %3230 = vst [vmem:[#allocation34_spill] sm:$0xff] %v2760_v31  ;;  %v2762_v5 = vpop.f32.mrf.mxu3  ;;  %v2764_v21 = vpop.f32.mrf.mxu0 }
 0x114   :  { %3231 = vst [vmem:[#allocation35_spill] sm:$0xff] %v2762_v5  ;;  %v2766_v53 = vpop.f32.mrf.mxu1 }
 0x11a   :  { %v2768_v12 = vpop.f32.mrf.mxu2 }
 0x11b   :  { %3232 = vst [vmem:[#allocation36_spill] sm:$0xff] %v2768_v12  ;;  %v2770_v15 = vpop.f32.mrf.mxu3  ;;  %v490_v17 = vpop.f32.mrf.mxu0 }
 0x11c   :  { %3233 = vst [vmem:[#allocation37_spill] sm:$0xff] %v2770_v15  ;;  %v539_v13 = vpop.f32.mrf.mxu1  ;;  %v491_v25 = vadd.f32 %v490_v17, %v2591_v37 }
 0x11d   :  { %v540_v28 = vadd.f32 %v539_v13, %v2593_v38 }
 0x11e   :  { %v687_v31 = vadd.f32 %v2779_v2, %v491_v25 }
 0x11f   :  { %v688_v37 = vadd.f32 %v2783_v29, %v540_v28 }
 0x120   :  { %v751_v13 = vmax.f32 %v687_v31, 0.0 }
 0x121   :  { %v752_v3 = vmax.f32 %v688_v37, 0.0 }
 0x122   :  { %v2785_v14 = vpop.f32.mrf.mxu2 }
 0x123   :  { %v2787_v32 = vpop.f32.mrf.mxu3  ;;  %v492_v5 = vpop.f32.mrf.mxu0 }
 0x124   :  { %v493_v15 = vadd.f32 %v492_v5, %v2603_v41  ;;  %v541_v12 = vpop.f32.mrf.mxu1 }
 0x125   :  { %v542_v17 = vadd.f32 %v541_v12, %v2605_v42 }
 0x126   :  { %v691_v30 = vadd.f32 %v2779_v2, %v493_v15 }
 0x127   :  { %v692_v38 = vadd.f32 %v2783_v29, %v542_v17 }
 0x128   :  { %v755_v19 = vmax.f32 %v691_v30, 0.0 }
 0x129   :  { %v756_v9 = vmax.f32 %v692_v38, 0.0 }
 0x12a   :  { %v815_v8 = vpack.c.bf16 %v755_v19, %v751_v13  ;;  %v2795_v22 = vpop.f32.mrf.mxu2 }
 0x12b   :  { %v816_v20 = vpack.c.bf16 %v756_v9, %v752_v3  ;;  %v2797_v25 = vpop.f32.mrf.mxu3  ;;  %v495_v41 = vpop.f32.mrf.mxu0 }
 0x12c   :  { %v544_v5 = vpop.f32.mrf.mxu1  ;;  %1053 = vmatmul.bf16.vlgmr.msra.gmra.mxu0 %v815_v8  ;;  %1151 = vmatmul.bf16.vlgmr.msra.gmra.mxu2 %v815_v8  ;;  %v496_v42 = vadd.f32 %v495_v41, %v2614_v46 }
 0x12d   :  { %1102 = vmatmul.bf16.vlgmr.msra.gmra.mxu1 %v816_v20  ;;  %1200 = vmatmul.bf16.vlgmr.msra.gmra.mxu3 %v816_v20  ;;  %v545_v12 = vadd.f32 %v544_v5, %v2616_v47 }
 0x12e   :  { %v695_v15 = vadd.f32 %v2779_v2, %v496_v42 }
 0x12f   :  { %v696_v28 = vadd.f32 %v2783_v29, %v545_v12 }
 0x130   :  { %v759_v37 = vmax.f32 %v695_v15, 0.0 }
 0x131   :  { %v760_v17 = vmax.f32 %v696_v28, 0.0 }
 0x132   :  { %v2801_v31 = vpop.f32.mrf.mxu2 }
 0x133   :  { %v2803_v30 = vpop.f32.mrf.mxu3  ;;  %v497_v19 = vpop.f32.mrf.mxu0 }
 0x134   :  { %v498_v9 = vadd.f32 %v497_v19, %v2626_v50  ;;  %v546_v3 = vpop.f32.mrf.mxu1 }
 0x135   :  { %v547_v8 = vadd.f32 %v546_v3, %v2628_v51 }
 0x136   :  { %v699_v20 = vadd.f32 %v2779_v2, %v498_v9 }
 0x137   :  { %v700_v46 = vadd.f32 %v2783_v29, %v547_v8 }
 0x138   :  { %v763_v47 = vmax.f32 %v699_v20, 0.0 }
 0x139   :  { %v764_v38 = vmax.f32 %v700_v46, 0.0 }
 0x13a   :  { %v2811_v13 = vpop.f32.mrf.mxu2  ;;  %v817_v41 = vpack.c.bf16 %v763_v47, %v759_v37 }
 0x13b   :  { %v2813_v5 = vpop.f32.mrf.mxu3  ;;  %v500_v42 = vpop.f32.mrf.mxu0  ;;  %v818_v50 = vpack.c.bf16 %v764_v38, %v760_v17 }
 0x13c   :  { %v549_v19 = vpop.f32.mrf.mxu1  ;;  %1058 = vmatmul.bf16.gmra.mxu0 %v817_v41  ;;  %1156 = vmatmul.bf16.gmra.mxu2 %v817_v41  ;;  %v501_v51 = vadd.f32 %v500_v42, %v2637_v55 }
 0x13d   :  { %1107 = vmatmul.bf16.gmra.mxu1 %v818_v50  ;;  %1205 = vmatmul.bf16.gmra.mxu3 %v818_v50  ;;  %v550_v12 = vadd.f32 %v549_v19, %v2639_v56 }
 0x13e   :  { %v703_v28 = vadd.f32 %v2779_v2, %v501_v51 }
 0x13f   :  { %v704_v46 = vadd.f32 %v2783_v29, %v550_v12 }
 0x140   :  { %v767_v17 = vmax.f32 %v703_v28, 0.0  ;;  %v2293_v28 = vld [vmem:[#allocation7 + $0x74] sm:$0xf] }
 0x141   :  { %v768_v38 = vmax.f32 %v704_v46, 0.0 }
 0x142   :  { %v2817_v15 = vpop.f32.mrf.mxu2 }
 0x143   :  { %v2819_v9 = vpop.f32.mrf.mxu3  ;;  %v502_v3 = vpop.f32.mrf.mxu0 }
 0x144   :  { %v503_v8 = vadd.f32 %v502_v3, %v2649_v59  ;;  %v551_v20 = vpop.f32.mrf.mxu1 }
 0x145   :  { %v552_v37 = vadd.f32 %v551_v20, %v2651_v60 }
 0x146   :  { %v707_v47 = vadd.f32 %v2779_v2, %v503_v8  ;;  %v2163_v8 = vld [vmem:[#allocation7 + $0x78] sm:$0xf0] }
 0x147   :  { %v708_v55 = vadd.f32 %v2783_v29, %v552_v37  ;;  %v2166_v46 = vor.u32 %v2293_v28, %v2163_v8  ;;  %v2309_v37 = vld [vmem:[#allocation7 + $0xf4] sm:$0xf] }
 0x148   :  { %v771_v56 = vmax.f32 %v707_v47, 0.0  ;;  %v2227_v47 = vld [vmem:[#allocation7 + $0xf8] sm:$0xf0] }
 0x149   :  { %v772_v41 = vmax.f32 %v708_v55, 0.0  ;;  %1585 = vmatpush.bf16.msrb.mxu2 %v2166_v46  ;;  %v2225_v46 = vld [vmem:[#allocation7 + $0xf0] sm:$0xf] }
 0x14a   :  { %v2827_v42 = vpop.f32.mrf.mxu2  ;;  %v819_v50 = vpack.c.bf16 %v771_v56, %v767_v17  ;;  %v2230_v56 = vor.u32 %v2309_v37, %v2227_v47  ;;  %v2161_v37 = vld [vmem:[#allocation7 + $0x70] sm:$0xf]  ;;  %v2294_v47 = vld [vmem:[#allocation7 + $0x74] sm:$0xf0] }
 0x14b   :  { %v2829_v19 = vpop.f32.mrf.mxu3  ;;  %v505_v51 = vpop.f32.mrf.mxu0  ;;  %v820_v59 = vpack.c.bf16 %v772_v41, %v768_v38 }
 0x14c   :  { %v554_v3 = vpop.f32.mrf.mxu1  ;;  %1063 = vmatmul.bf16.gmra.mxu0 %v819_v50  ;;  %1161 = vmatmul.bf16.gmra.mxu2 %v819_v50  ;;  %v506_v60 = vadd.f32 %v505_v51, %v2660_v0 }
 0x14d   :  { %1112 = vmatmul.bf16.gmra.mxu1 %v820_v59  ;;  %1210 = vmatmul.bf16.gmra.mxu3 %v820_v59  ;;  %v555_v12 = vadd.f32 %v554_v3, %v2662_v1 }
 0x14e   :  { %v711_v38 = vadd.f32 %v2779_v2, %v506_v60  ;;  %1634 = vmatpush.bf16.msrb.mxu3 %v2230_v56 }
 0x14f   :  { %v712_v0 = vadd.f32 %v2783_v29, %v555_v12 }
 0x150   :  { %v775_v3 = vmax.f32 %v711_v38, 0.0 }
 0x151   :  { %v776_v8 = vmax.f32 %v712_v0, 0.0 }
 0x152   :  { %v2833_v20 = vpop.f32.mrf.mxu2 }
 0x153   :  { %3234 = vst [vmem:[#allocation38_spill] sm:$0xff] %v2833_v20  ;;  %v2835_v55 = vpop.f32.mrf.mxu3  ;;  %v507_v17 = vpop.f32.mrf.mxu0  ;;  %v2310_v20 = vld [vmem:[#allocation7 + $0xf4] sm:$0xf0] }
 0x154   :  { %3235 = vst [vmem:[#allocation39_spill] sm:$0xff] %v2835_v55  ;;  %v508_v41 = vadd.f32 %v507_v17, %v2672_v10  ;;  %v556_v50 = vpop.f32.mrf.mxu1  ;;  %v2162_v17 = vor.u32 %v2294_v47, %v2161_v37  ;;  %v2219_v37 = vld [vmem:[#allocation7 + $0xe8] sm:$0xf0] }
 0x155   :  { %v557_v1 = vadd.f32 %v556_v50, %v2674_v11  ;;  %v2226_v50 = vor.u32 %v2310_v20, %v2225_v46 }
 0x156   :  { %v715_v51 = vadd.f32 %v2779_v2, %v508_v41  ;;  %1487 = vmatpush.bf16.msrb.mxu0 %v2162_v17 }
 0x157   :  { %v716_v59 = vadd.f32 %v2783_v29, %v557_v1  ;;  %1536 = vmatpush.bf16.msrb.mxu1 %v2226_v50  ;;  %v2291_v1 = vld [vmem:[#allocation7 + $0x64] sm:$0xf] }
 0x158   :  { %v779_v28 = vmax.f32 %v715_v51, 0.0  ;;  %v2155_v51 = vld [vmem:[#allocation7 + $0x68] sm:$0xf0] }
 0x159   :  { %v780_v55 = vmax.f32 %v716_v59, 0.0 }
 0x15a   :  { %v2843_v60 = vpop.f32.mrf.mxu2  ;;  %v821_v10 = vpack.c.bf16 %v779_v28, %v775_v3  ;;  %v2158_v3 = vor.u32 %v2291_v1, %v2155_v51  ;;  %v2307_v28 = vld [vmem:[#allocation7 + $0xe4] sm:$0xf]  ;;  %v2153_v51 = vld [vmem:[#allocation7 + $0x60] sm:$0xf] }
 0x15b   :  { %v2845_v12 = vpop.f32.mrf.mxu3  ;;  %v510_v11 = vpop.f32.mrf.mxu0  ;;  %v822_v56 = vpack.c.bf16 %v780_v55, %v776_v8  ;;  %v2222_v8 = vor.u32 %v2307_v28, %v2219_v37  ;;  %v2292_v28 = vld [vmem:[#allocation7 + $0x64] sm:$0xf0] }
 0x15c   :  { %v559_v41 = vpop.f32.mrf.mxu1  ;;  %1068 = vmatmul.bf16.gmra.mxu0 %v821_v10  ;;  %1166 = vmatmul.bf16.gmra.mxu2 %v821_v10  ;;  %v511_v38 = vadd.f32 %v510_v11, %v2683_v23  ;;  %v2154_v37 = vor.u32 %v2292_v28, %v2153_v51 }
 0x15d   :  { %1117 = vmatmul.bf16.gmra.mxu1 %v822_v56  ;;  %1215 = vmatmul.bf16.gmra.mxu3 %v822_v56  ;;  %v560_v0 = vadd.f32 %v559_v41, %v2685_v24 }
 0x15e   :  { %v719_v47 = vadd.f32 %v2779_v2, %v511_v38  ;;  %1586 = vmatpush.bf16.msrb.mxu2 %v2158_v3  ;;  %1635 = vmatpush.bf16.msrb.mxu3 %v2222_v8 }
 0x15f   :  { %v720_v23 = vadd.f32 %v2783_v29, %v560_v0  ;;  %1488 = vmatpush.bf16.msrb.mxu0 %v2154_v37  ;;  %v2209_v37 = vld [vmem:[#allocation7 + $0xd0] sm:$0xf] }
 0x160   :  { %v783_v56 = vmax.f32 %v719_v47, 0.0 }
 0x161   :  { %v784_v41 = vmax.f32 %v720_v23, 0.0  ;;  %v2289_v23 = vld [vmem:[#allocation7 + $0x54] sm:$0xf] }
 0x162   :  { %v2849_v59 = vpop.f32.mrf.mxu2 }
 0x163   :  { %v2851_v55 = vpop.f32.mrf.mxu3  ;;  %v512_v20 = vpop.f32.mrf.mxu0 }
 0x164   :  { %3236 = vst [vmem:[#allocation40_spill] sm:$0xff] %v2851_v55  ;;  %v513_v10 = vadd.f32 %v512_v20, %v2695_v33  ;;  %v561_v17 = vpop.f32.mrf.mxu1  ;;  %v2217_v33 = vld [vmem:[#allocation7 + $0xe0] sm:$0xf]  ;;  %v2308_v20 = vld [vmem:[#allocation7 + $0xe4] sm:$0xf0] }
 0x165   :  { %v562_v24 = vadd.f32 %v561_v17, %v2697_v34  ;;  %v2218_v34 = vor.u32 %v2308_v20, %v2217_v33 }
 0x166   :  { %v723_v46 = vadd.f32 %v2779_v2, %v513_v10 }
 0x167   :  { %v724_v11 = vadd.f32 %v2783_v29, %v562_v24  ;;  %1537 = vmatpush.bf16.msrb.mxu1 %v2218_v34  ;;  %v2147_v24 = vld [vmem:[#allocation7 + $0x58] sm:$0xf0] }
 0x168   :  { %v787_v50 = vmax.f32 %v723_v46, 0.0  ;;  %v2150_v46 = vor.u32 %v2289_v23, %v2147_v24 }
 0x169   :  { %v788_v1 = vmax.f32 %v724_v11, 0.0  ;;  %v2305_v11 = vld [vmem:[#allocation7 + $0xd4] sm:$0xf] }
 0x16a   :  { %v823_v38 = vpack.c.bf16 %v787_v50, %v783_v56  ;;  %v2859_v3 = vpop.f32.mrf.mxu2  ;;  %v2211_v56 = vld [vmem:[#allocation7 + $0xd8] sm:$0xf0]  ;;  %1587 = vmatpush.bf16.msrb.mxu2 %v2150_v46  ;;  %v2137_v46 = vld [vmem:[#allocation7 + $0x40] sm:$0xf] }
 0x16b   :  { %v515_v0 = vpop.f32.mrf.mxu0  ;;  %v824_v55 = vpack.c.bf16 %v788_v1, %v784_v41  ;;  %v2861_v8 = vpop.f32.mrf.mxu3  ;;  %v2214_v41 = vor.u32 %v2305_v11, %v2211_v56 }
 0x16c   :  { %v564_v10 = vpop.f32.mrf.mxu1  ;;  %1073 = vmatmul.bf16.gmra.mxu0 %v823_v38  ;;  %1171 = vmatmul.bf16.gmra.mxu2 %v823_v38  ;;  %v516_v47 = vadd.f32 %v515_v0, %v2706_v6  ;;  %v2290_v38 = vld [vmem:[#allocation7 + $0x54] sm:$0xf0] }
 0x16d   :  { %1122 = vmatmul.bf16.gmra.mxu1 %v824_v55  ;;  %1220 = vmatmul.bf16.gmra.mxu3 %v824_v55  ;;  %v565_v17 = vadd.f32 %v564_v10, %v2708_v7  ;;  %v2145_v55 = vld [vmem:[#allocation7 + $0x50] sm:$0xf]  ;;  %v2306_v0 = vld [vmem:[#allocation7 + $0xd4] sm:$0xf0] }
 0x16e   :  { %v727_v1 = vadd.f32 %v2779_v2, %v516_v47  ;;  %1636 = vmatpush.bf16.msrb.mxu3 %v2214_v41  ;;  %v2146_v20 = vor.u32 %v2290_v38, %v2145_v55  ;;  %v2210_v47 = vor.u32 %v2306_v0, %v2209_v37  ;;  %v2304_v41 = vld [vmem:[#allocation7 + $0xc4] sm:$0xf0]  ;;  %v2287_v38 = vld [vmem:[#allocation7 + $0x44] sm:$0xf] }
 0x16f   :  { %v728_v6 = vadd.f32 %v2783_v29, %v565_v17  ;;  %v2288_v17 = vld [vmem:[#allocation7 + $0x44] sm:$0xf0] }
 0x170   :  { %1489 = vmatpush.bf16.msrb.mxu0 %v2146_v20  ;;  %v791_v23 = vmax.f32 %v727_v1, 0.0  ;;  %1538 = vmatpush.bf16.msrb.mxu1 %v2210_v47  ;;  %v2203_v20 = vld [vmem:[#allocation7 + $0xc8] sm:$0xf0]  ;;  %v2193_v47 = vld [vmem:[#allocation7 + $0xb0] sm:$0xf] }
 0x171   :  { %v792_v11 = vmax.f32 %v728_v6, 0.0  ;;  %v2286_v6 = vld [vmem:[#allocation7 + $0x34] sm:$0xf0] }
 0x172   :  { %v2868_v33 = vpop.f32.mrf.mxu2 }
 0x173   :  { %v517_v50 = vpop.f32.mrf.mxu0  ;;  %3237 = vst [vmem:[#allocation41_spill] sm:$0xff] %v2868_v33  ;;  %v2871_v34 = vpop.f32.mrf.mxu3  ;;  %v2303_v33 = vld [vmem:[#allocation7 + $0xc4] sm:$0xf] }
 0x174   :  { %v518_v51 = vadd.f32 %v517_v50, %v2718_v26  ;;  %v566_v28 = vpop.f32.mrf.mxu1  ;;  %3238 = vst [vmem:[#allocation42_spill] sm:$0xff] %v2871_v34  ;;  %v2138_v50 = vor.u32 %v2288_v17, %v2137_v46  ;;  %v2139_v34 = vld [vmem:[#allocation7 + $0x48] sm:$0xf0]  ;;  %v2206_v0 = vor.u32 %v2303_v33, %v2203_v20  ;;  %v2131_v46 = vld [vmem:[#allocation7 + $0x38] sm:$0xf0] }
 0x175   :  { %v567_v7 = vadd.f32 %v566_v28, %v2720_v27  ;;  %v2201_v27 = vld [vmem:[#allocation7 + $0xc0] sm:$0xf] }
 0x176   :  { %v731_v10 = vadd.f32 %v2779_v2, %v518_v51  ;;  %v2202_v55 = vor.u32 %v2304_v41, %v2201_v27  ;;  %1490 = vmatpush.bf16.msrb.mxu0 %v2138_v50  ;;  %1637 = vmatpush.bf16.msrb.mxu3 %v2206_v0  ;;  %v2299_v0 = vld [vmem:[#allocation7 + $0xa4] sm:$0xf] }
 0x177   :  { %v732_v26 = vadd.f32 %v2783_v29, %v567_v7  ;;  %v2142_v7 = vor.u32 %v2287_v38, %v2139_v34  ;;  %v2284_v38 = vld [vmem:[#allocation7 + $0x24] sm:$0xf0] }
 0x178   :  { %v795_v24 = vmax.f32 %v731_v10, 0.0  ;;  %v2129_v10 = vld [vmem:[#allocation7 + $0x30] sm:$0xf]  ;;  %1539 = vmatpush.bf16.msrb.mxu1 %v2202_v55  ;;  %v2185_v55 = vld [vmem:[#allocation7 + $0xa0] sm:$0xf] }
 0x179   :  { %v796_v56 = vmax.f32 %v732_v26, 0.0  ;;  %v2130_v26 = vor.u32 %v2286_v6, %v2129_v10  ;;  %1588 = vmatpush.bf16.msrb.mxu2 %v2142_v7  ;;  %v2300_v7 = vld [vmem:[#allocation7 + $0xa4] sm:$0xf0]  ;;  %v2283_v6 = vld [vmem:[#allocation7 + $0x24] sm:$0xf] }
 0x17a   :  { %v825_v28 = vpack.c.bf16 %v795_v24, %v791_v23  ;;  %v2302_v23 = vld [vmem:[#allocation7 + $0xb4] sm:$0xf0]  ;;  %v2285_v24 = vld [vmem:[#allocation7 + $0x34] sm:$0xf]  ;;  %v2875_v34 = vpop.f32.mrf.mxu2  ;;  %v2186_v10 = vor.u32 %v2300_v7, %v2185_v55  ;;  %v2179_v7 = vld [vmem:[#allocation7 + $0x98] sm:$0xf0] }
 0x17b   :  { %v520_v51 = vpop.f32.mrf.mxu0  ;;  %v826_v37 = vpack.c.bf16 %v796_v56, %v792_v11  ;;  %v2194_v17 = vor.u32 %v2302_v23, %v2193_v47  ;;  %v2301_v11 = vld [vmem:[#allocation7 + $0xb4] sm:$0xf]  ;;  %v2195_v56 = vld [vmem:[#allocation7 + $0xb8] sm:$0xf0]  ;;  %3239 = vst [vmem:[#allocation43_spill] sm:$0xff] %v2875_v34  ;;  %1491 = vmatpush.bf16.msrb.mxu0 %v2130_v26  ;;  %v2134_v50 = vor.u32 %v2285_v24, %v2131_v46  ;;  %v2877_v27 = vpop.f32.mrf.mxu3 }
 0x17c   :  { %v569_v1 = vpop.f32.mrf.mxu1  ;;  %1078 = vmatmul.bf16.gmra.mxu0 %v825_v28  ;;  %1176 = vmatmul.bf16.gmra.mxu2 %v825_v28  ;;  %v2198_v33 = vor.u32 %v2301_v11, %v2195_v56  ;;  %3240 = vst [vmem:[#allocation44_spill] sm:$0xff] %v2877_v27  ;;  %v521_v41 = vadd.f32 %v520_v51, %v2729_v35  ;;  %v2121_v28 = vld [vmem:[#allocation7 + $0x20] sm:$0xf]  ;;  %v2123_v47 = vld [vmem:[#allocation7 + $0x28] sm:$0xf0] }
 0x17d   :  { %1127 = vmatmul.bf16.gmra.mxu1 %v826_v37  ;;  %1225 = vmatmul.bf16.gmra.mxu3 %v826_v37  ;;  %v570_v37 = vadd.f32 %v569_v1, %v2731_v44  ;;  %v2122_v20 = vor.u32 %v2284_v38, %v2121_v28  ;;  %v2126_v23 = vor.u32 %v2283_v6, %v2123_v47  ;;  %v2187_v24 = vld [vmem:[#allocation7 + $0xa8] sm:$0xf0]  ;;  %v2113_v46 = vld [vmem:[#allocation7 + $0x10] sm:$0xf]  ;;  %v2282_v35 = vld [vmem:[#allocation7 + $0x14] sm:$0xf0] }
 0x17e   :  { %1540 = vmatpush.bf16.msrb.mxu1 %v2194_v17  ;;  %1589 = vmatpush.bf16.msrb.mxu2 %v2134_v50  ;;  %v735_v51 = vadd.f32 %v2779_v2, %v521_v41  ;;  %v2190_v11 = vor.u32 %v2299_v0, %v2187_v24  ;;  %v2114_v56 = vor.u32 %v2282_v35, %v2113_v46  ;;  %v2177_v17 = vld [vmem:[#allocation7 + $0x90] sm:$0xf]  ;;  %v2298_v50 = vld [vmem:[#allocation7 + $0x94] sm:$0xf0]  ;;  %v2281_v28 = vld [vmem:[#allocation7 + $0x14] sm:$0xf] }
 0x17f   :  { %1638 = vmatpush.bf16.msrb.mxu3 %v2198_v33  ;;  %1492 = vmatpush.bf16.msrb.mxu0 %v2122_v20  ;;  %v736_v38 = vadd.f32 %v2783_v29, %v570_v37  ;;  %v2115_v33 = vld [vmem:[#allocation7 + $0x18] sm:$0xf0]  ;;  %v2297_v20 = vld [vmem:[#allocation7 + $0x94] sm:$0xf]  ;;  %v2178_v41 = vor.u32 %v2298_v50, %v2177_v17  ;;  %v2105_v46 = vld [vmem:[#allocation7] sm:$0xf] }
 0x180   :  { %v2118_v47 = vor.u32 %v2281_v28, %v2115_v33  ;;  %v2182_v0 = vor.u32 %v2297_v20, %v2179_v7  ;;  %v2280_v37 = vld [vmem:[#allocation7 + $0x4] sm:$0xf0]  ;;  %v2169_v34 = vld [vmem:[#allocation7 + $0x80] sm:$0xf]  ;;  %v2295_v50 = vld [vmem:[#allocation7 + $0x84] sm:$0xf] }
 0x181   :  { %v800_v35 = vmax.f32 %v736_v38, 0.0  ;;  %v2106_v27 = vor.u32 %v2280_v37, %v2105_v46 }
 0x182   :  { %1541 = vmatpush.bf16.msrb.mxu1 %v2186_v10  ;;  %1590 = vmatpush.bf16.msrb.mxu2 %v2126_v23 }
 0x183   :  { %v522_v26 = vpop.f32.mrf.mxu0  ;;  %1639 = vmatpush.bf16.msrb.mxu3 %v2190_v11  ;;  %1493 = vmatpush.bf16.msrb.mxu0 %v2114_v56  ;;  %v2889_v10 = vpop.f32.mrf.mxu3  ;;  %v2279_v11 = vld [vmem:[#allocation7 + $0x4] sm:$0xf]  ;;  %v2107_v56 = vld [vmem:[#allocation7 + $0x8] sm:$0xf0] }
 0x184   :  { %v523_v44 = vadd.f32 %v522_v26, %v2741_v18  ;;  %v571_v1 = vpop.f32.mrf.mxu1  ;;  %v799_v26 = vmax.f32 %v735_v51, 0.0  ;;  %v2110_v38 = vor.u32 %v2279_v11, %v2107_v56  ;;  %v2914_v11 = vperm.slane %v2775_v4, 2 }
 0x185   :  { %v572_v55 = vadd.f32 %v571_v1, %v2743_v16  ;;  %v2887_v16 = vpop.f32.mrf.mxu2  ;;  %v638_v56 = vadd.f32 %v2787_v32, %v2601_v40 }
 0x186   :  { %v739_v6 = vadd.f32 %v2779_v2, %v523_v44  ;;  %v2296_v44 = vld [vmem:[#allocation7 + $0x84] sm:$0xf0]  ;;  %1542 = vmatpush.bf16.msrb.mxu1 %v2178_v41  ;;  %1591 = vmatpush.bf16.msrb.mxu2 %v2118_v47 }
 0x187   :  { %v740_v18 = vadd.f32 %v2783_v29, %v572_v55  ;;  %v2170_v17 = vor.u32 %v2296_v44, %v2169_v34  ;;  %1640 = vmatpush.bf16.msrb.mxu3 %v2182_v0  ;;  %1494 = vmatpush.bf16.msrb.mxu0 %v2106_v27  ;;  %v2171_v55 = vld [vmem:[#allocation7 + $0x88] sm:$0xf0] }
 0x188   :  { %v803_v24 = vmax.f32 %v739_v6, 0.0  ;;  %v2174_v20 = vor.u32 %v2295_v50, %v2171_v55  ;;  %v2919_v50 = vperm.slane %v2775_v4, 3 }
 0x189   :  { %v804_v1 = vmax.f32 %v740_v18, 0.0 }
 0x18a   :  { %v827_v23 = vpack.c.bf16 %v803_v24, %v799_v26  ;;  %1543 = vmatpush.bf16.msrb.mxu1 %v2170_v17  ;;  %1592 = vmatpush.bf16.msrb.mxu2 %v2110_v38 }
 0x18b   :  { %v525_v51 = vpop.f32.mrf.mxu0  ;;  %v828_v28 = vpack.c.bf16 %v804_v1, %v800_v35  ;;  %1641 = vmatpush.bf16.msrb.mxu3 %v2174_v20  ;;  %v2895_v47 = vpop.f32.mrf.mxu3 }
 0x18c   :  { %v574_v33 = vpop.f32.mrf.mxu1  ;;  %1083 = vmatmul.bf16.gmra.mxu0 %v827_v23  ;;  %1181 = vmatmul.bf16.gmra.mxu2 %v827_v23  ;;  %v526_v34 = vadd.f32 %v525_v51, %v2752_v36 }
 0x18d   :  { %1132 = vmatmul.bf16.gmra.mxu1 %v828_v28  ;;  %1230 = vmatmul.bf16.gmra.mxu3 %v828_v28  ;;  %v575_v7 = vadd.f32 %v574_v33, %v2754_v62  ;;  %v2893_v6 = vpop.f32.mrf.mxu2 }
 0x18e   :  { %v743_v27 = vadd.f32 %v2779_v2, %v526_v34 }
 0x18f   :  { %v744_v26 = vadd.f32 %v2783_v29, %v575_v7 }
 0x190   :  { %v807_v37 = vmax.f32 %v743_v27, 0.0 }
 0x191   :  { %v808_v35 = vmax.f32 %v744_v26, 0.0 }
 0x193   :  { %v527_v41 = vpop.f32.mrf.mxu0 }
 0x194   :  { %v528_v18 = vadd.f32 %v527_v41, %v2764_v21  ;;  %v576_v0 = vpop.f32.mrf.mxu1  ;;  %v591_v21 = vadd.f32 %v2795_v22, %v2607_v43 }
 0x195   :  { %v577_v24 = vadd.f32 %v576_v0, %v2766_v53  ;;  %v2903_v17 = vpop.f32.mrf.mxu2  ;;  %v2907_v53 = vpop.f32.mrf.mxu3  ;;  %v645_v0 = vadd.f32 %v2813_v5, %v2635_v54 }
 0x196   :  { %v747_v46 = vadd.f32 %v2779_v2, %v528_v18  ;;  %v640_v2 = vadd.f32 %v2797_v25, %v2612_v45  ;;  %v693_v51 = vadd.f32 %v2914_v11, %v591_v21  ;;  %v879_v45 = vld [vmem:[%s3204_s6] sm:$0x3]  ;;  %v596_v18 = vadd.f32 %v2811_v13, %v2630_v52 }
 0x197   :  { %v748_v36 = vadd.f32 %v2783_v29, %v577_v24  ;;  %v589_v29 = vadd.f32 %v2785_v14, %v2599_v39  ;;  %v690_v39 = vadd.f32 %v2919_v50, %v638_v56  ;;  %v2928_v25 = vperm.slane %v879_v45, 0 }
 0x198   :  { %v811_v62 = vmax.f32 %v747_v46, 0.0  ;;  %v694_v43 = vadd.f32 %v2919_v50, %v640_v2  ;;  %v757_v14 = vmax.f32 %v693_v51, 0.0  ;;  %v2935_v27 = vperm.slane %v879_v45, 1 }
 0x199   :  { %v812_v1 = vmax.f32 %v748_v36, 0.0  ;;  %v689_v22 = vadd.f32 %v2914_v11, %v589_v29  ;;  %v754_v38 = vmax.f32 %v690_v39, 0.0  ;;  %v594_v24 = vadd.f32 %v2801_v31, %v2622_v48 }
 0x19a   :  { %v829_v44 = vpack.c.bf16 %v811_v62, %v807_v37  ;;  %v758_v28 = vmax.f32 %v694_v43, 0.0  ;;  %v643_v37 = vadd.f32 %v2803_v30, %v2624_v49  ;;  %v702_v13 = vadd.f32 %v2919_v50, %v645_v0 }
 0x19b   :  { %v830_v23 = vpack.c.bf16 %v812_v1, %v808_v35  ;;  %v753_v4 = vmax.f32 %v689_v22, 0.0  ;;  %v701_v35 = vadd.f32 %v2914_v11, %v596_v18  ;;  %v697_v54 = vadd.f32 %v2914_v11, %v594_v24 }
 0x19c   :  { %1088 = vmatmul.bf16.gmra.mxu0 %v829_v44  ;;  %1186 = vmatmul.bf16.gmra.mxu2 %v829_v44  ;;  %v832_v7 = vpack.c.bf16 %v758_v28, %v754_v38  ;;  %v698_v48 = vadd.f32 %v2919_v50, %v643_v37  ;;  %v766_v2 = vmax.f32 %v702_v13, 0.0  ;;  %v599_v18 = vadd.f32 %v2817_v15, %v2645_v57 }
 0x19d   :  { %1137 = vmatmul.bf16.gmra.mxu1 %v830_v23  ;;  %1235 = vmatmul.bf16.gmra.mxu3 %v830_v23  ;;  %v2930_v40 = vpop.f32.mrf.mxu2  ;;  %v2932_v32 = vpop.f32.mrf.mxu3  ;;  %v831_v33 = vpack.c.bf16 %v757_v14, %v753_v4  ;;  %v765_v31 = vmax.f32 %v701_v35, 0.0  ;;  %v761_v49 = vmax.f32 %v697_v54, 0.0  ;;  %v648_v24 = vadd.f32 %v2819_v9, %v2647_v58 }
 0x19e   :  { %v762_v43 = vmax.f32 %v698_v48, 0.0 }
 0x19f   :  { %v833_v28 = vpack.c.bf16 %v765_v31, %v761_v49  ;;  %v706_v57 = vadd.f32 %v2919_v50, %v648_v24 }
 0x1a0   :  { %v834_v4 = vpack.c.bf16 %v766_v2, %v762_v43  ;;  %v3241_v43 = vld [vmem:[#allocation20_spill] sm:$0xff] }
 0x1a9   :  { %v1054_v55 = vpop.f32.mrf.mxu0 }
 0x1aa   :  { %v1055_v20 = vadd.f32 %v1054_v55, %v2928_v25  ;;  %v1103_v34 = vpop.f32.mrf.mxu1 }
 0x1ac   :  { %v1104_v41 = vadd.f32 %v1103_v34, %v1055_v20  ;;  %1495 = vmatmul.bf16.vlgmr.msrb.gmra.mxu0 %v831_v33  ;;  %1593 = vmatmul.bf16.vlgmr.msrb.gmra.mxu2 %v831_v33  ;;  %v601_v20 = vadd.f32 %v2827_v42, %v2653_v61 }
 0x1ad   :  { %1544 = vmatmul.bf16.vlgmr.msrb.gmra.mxu1 %v832_v7  ;;  %1642 = vmatmul.bf16.vlgmr.msrb.gmra.mxu3 %v832_v7  ;;  %v650_v7 = vadd.f32 %v2829_v19, %v2658_v63  ;;  %v705_v63 = vadd.f32 %v2914_v11, %v599_v18 }
 0x1ae   :  { %v1241_v23 = vmax.f32 %v1104_v41, 0.0 }
 0x1af   :  { %v1152_v26 = vpop.f32.mrf.mxu2  ;;  %v769_v58 = vmax.f32 %v705_v63, 0.0 }
 0x1b0   :  { %v1153_v46 = vadd.f32 %v1152_v26, %v2935_v27  ;;  %v1201_v36 = vpop.f32.mrf.mxu3 }
 0x1b1   :  { %v1056_v62 = vpop.f32.mrf.mxu0 }
 0x1b2   :  { %v1202_v1 = vadd.f32 %v1201_v36, %v1153_v46  ;;  %v1057_v44 = vadd.f32 %v1056_v62, %v2928_v25  ;;  %v1105_v52 = vpop.f32.mrf.mxu1  ;;  %v709_v36 = vadd.f32 %v2914_v11, %v601_v20  ;;  %v710_v62 = vadd.f32 %v2919_v50, %v650_v7  ;;  %v3245_v7 = vld [vmem:[#allocation19_spill] sm:$0xff] }
 0x1b4   :  { %v1106_v5 = vadd.f32 %v1105_v52, %v1057_v44  ;;  %v1242_v38 = vmax.f32 %v1202_v1, 0.0  ;;  %v773_v15 = vmax.f32 %v709_v36, 0.0  ;;  %v774_v44 = vmax.f32 %v710_v62, 0.0 }
 0x1b6   :  { %v1243_v21 = vmax.f32 %v1106_v5, 0.0  ;;  %v770_v5 = vmax.f32 %v706_v57, 0.0  ;;  %v835_v2 = vpack.c.bf16 %v773_v15, %v769_v58 }
 0x1b7   :  { %v1154_v29 = vpop.f32.mrf.mxu2 }
 0x1b8   :  { %v1155_v30 = vadd.f32 %v1154_v29, %v2935_v27  ;;  %v1203_v56 = vpop.f32.mrf.mxu3  ;;  %v2952_v51 = vpack.c.bf16 %v1243_v21, %v1241_v23  ;;  %v836_v29 = vpack.c.bf16 %v774_v44, %v770_v5 }
 0x1b9   :  { %v1059_v45 = vpop.f32.mrf.mxu0 }
 0x1ba   :  { %v1204_v22 = vadd.f32 %v1203_v56, %v1155_v30  ;;  %v1060_v39 = vadd.f32 %v1059_v45, %v2928_v25  ;;  %v1108_v14 = vpop.f32.mrf.mxu1  ;;  %v606_v45 = vadd.f32 %v2843_v60, %v3241_v43 }
 0x1bc   :  { %v1244_v55 = vmax.f32 %v1204_v22, 0.0  ;;  %v1109_v33 = vadd.f32 %v1108_v14, %v1060_v39  ;;  %1500 = vmatmul.bf16.gmra.mxu0 %v833_v28  ;;  %1598 = vmatmul.bf16.gmra.mxu2 %v833_v28  ;;  %v3242_v39 = vld [vmem:[#allocation21_spill] sm:$0xff] }
 0x1bd   :  { %1549 = vmatmul.bf16.gmra.mxu1 %v834_v4  ;;  %1647 = vmatmul.bf16.gmra.mxu3 %v834_v4  ;;  %v655_v14 = vadd.f32 %v2845_v12, %v3242_v39  ;;  %v3243_v4 = vld [vmem:[#allocation18_spill] sm:$0xff] }
 0x1be   :  { %v2957_v34 = vpack.c.bf16 %v1244_v55, %v1242_v38  ;;  %v1245_v35 = vmax.f32 %v1109_v33, 0.0  ;;  %v3244_v38 = vld [vmem:[#allocation38_spill] sm:$0xff] }
 0x1bf   :  { %v1157_v41 = vpop.f32.mrf.mxu2  ;;  %v604_v55 = vadd.f32 %v3244_v38, %v3243_v4  ;;  %v718_v36 = vadd.f32 %v2919_v50, %v655_v14  ;;  %v3249_v39 = vld [vmem:[#allocation22_spill] sm:$0xff]  ;;  %v3250_v38 = vld [vmem:[#allocation23_spill] sm:$0xff] }
 0x1c0   :  { %v1158_v0 = vadd.f32 %v1157_v41, %v2935_v27  ;;  %v1206_v26 = vpop.f32.mrf.mxu3  ;;  %v3246_v41 = vld [vmem:[#allocation39_spill] sm:$0xff]  ;;  %v609_v14 = vadd.f32 %v2849_v59, %v3249_v39 }
 0x1c1   :  { %v1061_v46 = vpop.f32.mrf.mxu0  ;;  %v653_v18 = vadd.f32 %v3246_v41, %v3245_v7  ;;  %v713_v12 = vadd.f32 %v2914_v11, %v604_v55  ;;  %v3251_v55 = vld [vmem:[#allocation40_spill] sm:$0xff] }
 0x1c2   :  { %v1207_v37 = vadd.f32 %v1206_v26, %v1158_v0  ;;  %v1062_v61 = vadd.f32 %v1061_v46, %v2928_v25  ;;  %v1110_v42 = vpop.f32.mrf.mxu1  ;;  %v717_v26 = vadd.f32 %v2914_v11, %v606_v45 }
 0x1c3   :  { %v777_v15 = vmax.f32 %v713_v12, 0.0 }
 0x1c4   :  { %v1111_v19 = vadd.f32 %v1110_v42, %v1062_v61  ;;  %v1246_v49 = vmax.f32 %v1207_v37, 0.0  ;;  %v714_v61 = vadd.f32 %v2919_v50, %v653_v18  ;;  %v781_v42 = vmax.f32 %v717_v26, 0.0 }
 0x1c6   :  { %v1247_v1 = vmax.f32 %v1111_v19, 0.0  ;;  %v782_v19 = vmax.f32 %v718_v36, 0.0 }
 0x1c7   :  { %v1159_v52 = vpop.f32.mrf.mxu2 }
 0x1c8   :  { %v1160_v9 = vadd.f32 %v1159_v52, %v2935_v27  ;;  %v1208_v13 = vpop.f32.mrf.mxu3  ;;  %v2972_v54 = vpack.c.bf16 %v1247_v1, %v1245_v35  ;;  %v778_v52 = vmax.f32 %v714_v61, 0.0 }
 0x1c9   :  { %v1064_v48 = vpop.f32.mrf.mxu0 }
 0x1ca   :  { %v1209_v31 = vadd.f32 %v1208_v13, %v1160_v9  ;;  %v1065_v23 = vadd.f32 %v1064_v48, %v2928_v25  ;;  %v1113_v21 = vpop.f32.mrf.mxu1  ;;  %v837_v48 = vpack.c.bf16 %v781_v42, %v777_v15 }
 0x1cc   :  { %v1248_v30 = vmax.f32 %v1209_v31, 0.0  ;;  %v1114_v56 = vadd.f32 %v1113_v21, %v1065_v23  ;;  %1505 = vmatmul.bf16.gmra.mxu0 %v835_v2  ;;  %1603 = vmatmul.bf16.gmra.mxu2 %v835_v2  ;;  %v838_v31 = vpack.c.bf16 %v782_v19, %v778_v52 }
 0x1cd   :  { %1554 = vmatmul.bf16.gmra.mxu1 %v836_v29  ;;  %1652 = vmatmul.bf16.gmra.mxu3 %v836_v29  ;;  %v3247_v29 = vld [vmem:[#allocation24_spill] sm:$0xff] }
 0x1ce   :  { %v2977_v22 = vpack.c.bf16 %v1248_v30, %v1246_v49  ;;  %v1249_v62 = vmax.f32 %v1114_v56, 0.0  ;;  %v611_v49 = vadd.f32 %v2859_v3, %v3247_v29  ;;  %v3248_v56 = vld [vmem:[#allocation25_spill] sm:$0xff] }
 0x1cf   :  { %v1162_v28 = vpop.f32.mrf.mxu2  ;;  %v660_v43 = vadd.f32 %v2861_v8, %v3248_v56  ;;  %v721_v8 = vadd.f32 %v2914_v11, %v609_v14  ;;  %v3256_v56 = vld [vmem:[#allocation26_spill] sm:$0xff] }
 0x1d0   :  { %v1163_v33 = vadd.f32 %v1162_v28, %v2935_v27  ;;  %v1211_v20 = vpop.f32.mrf.mxu3  ;;  %v725_v7 = vadd.f32 %v2914_v11, %v611_v49 }
 0x1d1   :  { %v1066_v0 = vpop.f32.mrf.mxu0 }
 0x1d2   :  { %v1212_v24 = vadd.f32 %v1211_v20, %v1163_v33  ;;  %v1067_v60 = vadd.f32 %v1066_v0, %v2928_v25  ;;  %v1115_v46 = vpop.f32.mrf.mxu1  ;;  %v658_v33 = vadd.f32 %v3251_v55, %v3250_v38  ;;  %v726_v0 = vadd.f32 %v2919_v50, %v660_v43  ;;  %v3257_v43 = vld [vmem:[#allocation41_spill] sm:$0xff] }
 0x1d4   :  { %v1116_v37 = vadd.f32 %v1115_v46, %v1067_v60  ;;  %v1250_v23 = vmax.f32 %v1212_v24, 0.0  ;;  %v722_v59 = vadd.f32 %v2919_v50, %v658_v33  ;;  %v789_v24 = vmax.f32 %v725_v7, 0.0 }
 0x1d5   :  { %v790_v36 = vmax.f32 %v726_v0, 0.0 }
 0x1d6   :  { %v1251_v63 = vmax.f32 %v1116_v37, 0.0  ;;  %v785_v37 = vmax.f32 %v721_v8, 0.0 }
 0x1d7   :  { %v1164_v57 = vpop.f32.mrf.mxu2 }
 0x1d8   :  { %v1165_v35 = vadd.f32 %v1164_v57, %v2935_v27  ;;  %v1213_v1 = vpop.f32.mrf.mxu3  ;;  %v2992_v44 = vpack.c.bf16 %v1251_v63, %v1249_v62  ;;  %v786_v63 = vmax.f32 %v722_v59, 0.0 }
 0x1d9   :  { %v1069_v58 = vpop.f32.mrf.mxu0 }
 0x1da   :  { %v1214_v9 = vadd.f32 %v1213_v1, %v1165_v35  ;;  %v1070_v13 = vadd.f32 %v1069_v58, %v2928_v25  ;;  %v1118_v5 = vpop.f32.mrf.mxu1  ;;  %v839_v1 = vpack.c.bf16 %v789_v24, %v785_v37  ;;  %v840_v52 = vpack.c.bf16 %v790_v36, %v786_v63  ;;  %v3261_v63 = vld [vmem:[#allocation33_spill] sm:$0xff] }
 0x1dc   :  { %v1252_v21 = vmax.f32 %v1214_v9, 0.0  ;;  %v1119_v2 = vadd.f32 %v1118_v5, %v1070_v13  ;;  %1510 = vmatmul.bf16.gmra.mxu0 %v837_v48  ;;  %1608 = vmatmul.bf16.gmra.mxu2 %v837_v48  ;;  %v3252_v5 = vld [vmem:[#allocation28_spill] sm:$0xff]  ;;  %v3253_v48 = vld [vmem:[#allocation43_spill] sm:$0xff] }
 0x1dd   :  { %1559 = vmatmul.bf16.gmra.mxu1 %v838_v31  ;;  %1657 = vmatmul.bf16.gmra.mxu3 %v838_v31  ;;  %v616_v31 = vadd.f32 %v3253_v48, %v3252_v5 }
 0x1de   :  { %v2997_v30 = vpack.c.bf16 %v1252_v21, %v1250_v23  ;;  %v1253_v60 = vmax.f32 %v1119_v2, 0.0  ;;  %v3254_v21 = vld [vmem:[#allocation29_spill] sm:$0xff]  ;;  %v3255_v2 = vld [vmem:[#allocation44_spill] sm:$0xff] }
 0x1df   :  { %v1167_v45 = vpop.f32.mrf.mxu2  ;;  %v665_v29 = vadd.f32 %v3255_v2, %v3254_v21  ;;  %v733_v33 = vadd.f32 %v2914_v11, %v616_v31 }
 0x1e0   :  { %v1168_v28 = vadd.f32 %v1167_v45, %v2935_v27  ;;  %v1216_v4 = vpop.f32.mrf.mxu3  ;;  %v614_v45 = vadd.f32 %v3257_v43, %v3256_v56 }
 0x1e1   :  { %v1071_v20 = vpop.f32.mrf.mxu0  ;;  %v797_v0 = vmax.f32 %v733_v33, 0.0 }
 0x1e2   :  { %v1217_v41 = vadd.f32 %v1216_v4, %v1168_v28  ;;  %v1072_v3 = vadd.f32 %v1071_v20, %v2928_v25  ;;  %v1120_v18 = vpop.f32.mrf.mxu1  ;;  %v3258_v28 = vld [vmem:[#allocation27_spill] sm:$0xff]  ;;  %v3259_v4 = vld [vmem:[#allocation42_spill] sm:$0xff] }
 0x1e3   :  { %v663_v38 = vadd.f32 %v3259_v4, %v3258_v28  ;;  %v3265_v4 = vld [vmem:[#allocation37_spill] sm:$0xff] }
 0x1e4   :  { %v1121_v26 = vadd.f32 %v1120_v18, %v1072_v3  ;;  %v1254_v58 = vmax.f32 %v1217_v41, 0.0  ;;  %v734_v41 = vadd.f32 %v2919_v50, %v665_v29  ;;  %v729_v3 = vadd.f32 %v2914_v11, %v614_v45 }
 0x1e5   :  { %v730_v18 = vadd.f32 %v2919_v50, %v663_v38  ;;  %v675_v38 = vadd.f32 %v2932_v32, %v3265_v4 }
 0x1e6   :  { %v1255_v46 = vmax.f32 %v1121_v26, 0.0  ;;  %v798_v8 = vmax.f32 %v734_v41, 0.0  ;;  %v793_v59 = vmax.f32 %v729_v3, 0.0  ;;  %v3266_v41 = vld [vmem:[#allocation34_spill] sm:$0xff] }
 0x1e7   :  { %v1169_v12 = vpop.f32.mrf.mxu2  ;;  %v624_v3 = vadd.f32 %v2903_v17, %v3266_v41 }
 0x1e8   :  { %v1170_v61 = vadd.f32 %v1169_v12, %v2935_v27  ;;  %v1218_v42 = vpop.f32.mrf.mxu3  ;;  %v3012_v62 = vpack.c.bf16 %v1255_v46, %v1253_v60  ;;  %v794_v60 = vmax.f32 %v730_v18, 0.0  ;;  %v841_v12 = vpack.c.bf16 %v797_v0, %v793_v59  ;;  %v3267_v0 = vld [vmem:[#allocation35_spill] sm:$0xff] }
 0x1e9   :  { %v1074_v19 = vpop.f32.mrf.mxu0 }
 0x1ea   :  { %v1219_v57 = vadd.f32 %v1218_v42, %v1170_v61  ;;  %v1075_v15 = vadd.f32 %v1074_v19, %v2928_v25  ;;  %v1123_v35 = vpop.f32.mrf.mxu1  ;;  %v842_v37 = vpack.c.bf16 %v798_v8, %v794_v60  ;;  %v3260_v61 = vld [vmem:[#allocation32_spill] sm:$0xff]  ;;  %v670_v19 = vadd.f32 %v2895_v47, %v3261_v63 }
 0x1eb   :  { %v621_v42 = vadd.f32 %v2893_v6, %v3260_v61  ;;  %v673_v8 = vadd.f32 %v2907_v53, %v3267_v0 }
 0x1ec   :  { %v1256_v9 = vmax.f32 %v1219_v57, 0.0  ;;  %v3015_v13 = vadd.f32 %v1123_v35, %v1075_v15  ;;  %1515 = vmatmul.bf16.gmra.mxu0 %v839_v1  ;;  %1613 = vmatmul.bf16.gmra.mxu2 %v839_v1  ;;  %v3262_v15 = vld [vmem:[#allocation30_spill] sm:$0xff]  ;;  %v742_v6 = vadd.f32 %v2919_v50, %v670_v19 }
 0x1ed   :  { %1564 = vmatmul.bf16.gmra.mxu1 %v840_v52  ;;  %1662 = vmatmul.bf16.gmra.mxu3 %v840_v52  ;;  %v619_v35 = vadd.f32 %v2887_v16, %v3262_v15  ;;  %v3263_v52 = vld [vmem:[#allocation31_spill] sm:$0xff]  ;;  %v741_v5 = vadd.f32 %v2914_v11, %v621_v42  ;;  %v746_v61 = vadd.f32 %v2919_v50, %v673_v8 }
 0x1ee   :  { %v3019_v23 = vpack.c.bf16 %v1256_v9, %v1254_v58  ;;  %v668_v58 = vadd.f32 %v2889_v10, %v3263_v52  ;;  %v806_v2 = vmax.f32 %v742_v6, 0.0 }
 0x1ef   :  { %v1172_v49 = vpop.f32.mrf.mxu2  ;;  %v737_v47 = vadd.f32 %v2914_v11, %v619_v35  ;;  %v805_v21 = vmax.f32 %v741_v5, 0.0  ;;  %v810_v15 = vmax.f32 %v746_v61, 0.0 }
 0x1f0   :  { %v1173_v39 = vadd.f32 %v1172_v49, %v2935_v27  ;;  %v1221_v14 = vpop.f32.mrf.mxu3  ;;  %v738_v31 = vadd.f32 %v2919_v50, %v668_v58 }
 0x1f1   :  { %v3028_v55 = vpop.f32.mrf.mxu0  ;;  %v801_v29 = vmax.f32 %v737_v47, 0.0 }
 0x1f2   :  { %v3031_v20 = vadd.f32 %v1221_v14, %v1173_v39  ;;  %v3033_v7 = vpop.f32.mrf.mxu1  ;;  %v802_v10 = vmax.f32 %v738_v31, 0.0  ;;  %v3264_v14 = vld [vmem:[#allocation36_spill] sm:$0xff] }
 0x1f3   :  { %v843_v45 = vpack.c.bf16 %v805_v21, %v801_v29  ;;  %v626_v28 = vadd.f32 %v2930_v40, %v3264_v14  ;;  %v745_v40 = vadd.f32 %v2914_v11, %v624_v3 }
 0x1f4   :  { %v844_v39 = vpack.c.bf16 %v806_v2, %v802_v10  ;;  %v1321_v2 = vld [vmem:[%s3206_s8] sm:$0x3]  ;;  %s2428_s8 = smov [#allocation9]  }
 0x1f5   :  { %v749_v60 = vadd.f32 %v2914_v11, %v626_v28  ;;  %v809_v19 = vmax.f32 %v745_v40, 0.0  ;;  %v3092_v4 = vperm.slane %v1321_v2, 0  ;;  %s1818_s10 = sshll.u32 %s2428_s8, 4  ;;  %s1819_s10 = int_to_ptr.vmem [resolvable:$true] %s1818_s10 }
 0x1f7   :  { %v3038_v26 = vpop.f32.mrf.mxu2  ;;  %v813_v32 = vmax.f32 %v749_v60, 0.0 }
 0x1f8   :  { %v3040_v24 = vpop.f32.mrf.mxu3 }
 0x1f9   :  { %v3042_v46 = vpop.f32.mrf.mxu0  ;;  %v845_v58 = vpack.c.bf16 %v813_v32, %v809_v19 }
 0x1fa   :  { %v3044_v36 = vpop.f32.mrf.mxu1 }
 0x1fc   :  { %1520 = vmatmul.bf16.gmra.mxu0 %v841_v12  ;;  %1618 = vmatmul.bf16.gmra.mxu2 %v841_v12 }
 0x1fd   :  { %1569 = vmatmul.bf16.gmra.mxu1 %v842_v37  ;;  %1667 = vmatmul.bf16.gmra.mxu3 %v842_v37  ;;  %v750_v37 = vadd.f32 %v2919_v50, %v675_v38 }
 0x1ff   :  { %v3050_v57 = vpop.f32.mrf.mxu2  ;;  %v814_v42 = vmax.f32 %v750_v37, 0.0 }
 0x200   :  { %v3054_v1 = vpop.f32.mrf.mxu3 }
 0x201   :  { %v3058_v9 = vpop.f32.mrf.mxu0  ;;  %v846_v53 = vpack.c.bf16 %v814_v42, %v810_v15 }
 0x202   :  { %v3061_v48 = vpop.f32.mrf.mxu1 }
 0x207   :  { %v3066_v16 = vpop.f32.mrf.mxu2 }
 0x208   :  { %v3068_v49 = vpop.f32.mrf.mxu3 }
 0x209   :  { %v1084_v56 = vpop.f32.mrf.mxu0 }
 0x20a   :  { %v1133_v43 = vpop.f32.mrf.mxu1 }
 0x20c   :  { %1525 = vmatmul.bf16.gmra.mxu0 %v843_v45  ;;  %1623 = vmatmul.bf16.gmra.mxu2 %v843_v45 }
 0x20d   :  { %1574 = vmatmul.bf16.gmra.mxu1 %v844_v39  ;;  %1672 = vmatmul.bf16.gmra.mxu3 %v844_v39  ;;  %v1085_v39 = vadd.f32 %v1084_v56, %v2928_v25  ;;  %v1082_v56 = vadd.f32 %v3058_v9, %v2928_v25 }
 0x20f   :  { %v1182_v33 = vpop.f32.mrf.mxu2  ;;  %v1134_v40 = vadd.f32 %v1133_v43, %v1085_v39  ;;  %v1080_v43 = vadd.f32 %v3042_v46, %v2928_v25 }
 0x210   :  { %v3076_v18 = vpop.f32.mrf.mxu3  ;;  %v1183_v19 = vadd.f32 %v1182_v33, %v2935_v27 }
 0x211   :  { %v1086_v59 = vpop.f32.mrf.mxu0 }
 0x212   :  { %v1135_v12 = vpop.f32.mrf.mxu1  ;;  %v1087_v29 = vadd.f32 %v1086_v59, %v2928_v25 }
 0x214   :  { %v1136_v41 = vadd.f32 %v1135_v12, %v1087_v29  ;;  %v3100_v12 = vperm.slane %v1321_v2, 1  ;;  %v1180_v2 = vadd.f32 %v3066_v16, %v2935_v27 }
 0x216   :  { %v1267_v15 = vmax.f32 %v1136_v41, 0.0 }
 0x217   :  { %v1184_v63 = vpop.f32.mrf.mxu2 }
 0x218   :  { %v1233_v17 = vpop.f32.mrf.mxu3  ;;  %v1185_v59 = vadd.f32 %v1184_v63, %v2935_v27  ;;  %v1265_v63 = vmax.f32 %v1134_v40, 0.0  ;;  %v1175_v40 = vadd.f32 %v3038_v26, %v2935_v27 }
 0x219   :  { %v1089_v35 = vpop.f32.mrf.mxu0 }
 0x21a   :  { %v1138_v52 = vpop.f32.mrf.mxu1  ;;  %v1090_v5 = vadd.f32 %v1089_v35, %v2928_v25  ;;  %v1285_v9 = vpack.c.bf16 %v1267_v15, %v1265_v63  ;;  %v1257_v15 = vmax.f32 %v3015_v13, 0.0  ;;  %v1258_v13 = vmax.f32 %v3031_v20, 0.0 }
 0x21c   :  { %1530 = vmatmul.bf16.gmra.mxu0 %v845_v58  ;;  %1628 = vmatmul.bf16.gmra.mxu2 %v845_v58  ;;  %v1139_v50 = vadd.f32 %v1138_v52, %v1090_v5 }
 0x21d   :  { %1579 = vmatmul.bf16.gmra.mxu1 %v846_v53  ;;  %1677 = vmatmul.bf16.gmra.mxu3 %v846_v53  ;;  %v1234_v53 = vadd.f32 %v1233_v17, %v1185_v59 }
 0x21e   :  { %v1269_v14 = vmax.f32 %v1139_v50, 0.0 }
 0x21f   :  { %v1187_v6 = vpop.f32.mrf.mxu2  ;;  %v1268_v46 = vmax.f32 %v1234_v53, 0.0 }
 0x220   :  { %v1236_v11 = vpop.f32.mrf.mxu3  ;;  %v1188_v10 = vadd.f32 %v1187_v6, %v2935_v27 }
 0x221   :  { %v1091_v47 = vpop.f32.mrf.mxu0 }
 0x222   :  { %v1092_v31 = vadd.f32 %v1091_v47, %v2928_v25  ;;  %v1140_v21 = vpop.f32.mrf.mxu1  ;;  %v1237_v3 = vadd.f32 %v1236_v11, %v1188_v10  ;;  %v1131_v11 = vadd.f32 %v3061_v48, %v1082_v56  ;;  %v1232_v47 = vadd.f32 %v3076_v18, %v1183_v19 }
 0x223   :  { %v1077_v48 = vadd.f32 %v3028_v55, %v2928_v25  ;;  %v1178_v18 = vadd.f32 %v3050_v57, %v2935_v27 }
 0x224   :  { %v1141_v45 = vadd.f32 %v1140_v21, %v1092_v31  ;;  %v1270_v35 = vmax.f32 %v1237_v3, 0.0  ;;  %v1129_v31 = vadd.f32 %v3044_v36, %v1080_v43  ;;  %v1266_v39 = vmax.f32 %v1232_v47, 0.0 }
 0x225   :  { %v1126_v3 = vadd.f32 %v3033_v7, %v1077_v48 }
 0x226   :  { %v1271_v28 = vmax.f32 %v1141_v45, 0.0  ;;  %v1263_v45 = vmax.f32 %v1131_v11, 0.0  ;;  %v1261_v36 = vmax.f32 %v1129_v31, 0.0 }
 0x227   :  { %v1189_v38 = vpop.f32.mrf.mxu2  ;;  %v1259_v7 = vmax.f32 %v1126_v3, 0.0 }
 0x228   :  { %v1287_v0 = vpack.c.bf16 %v1271_v28, %v1269_v14  ;;  %v1190_v8 = vadd.f32 %v1189_v38, %v2935_v27  ;;  %v1238_v60 = vpop.f32.mrf.mxu3  ;;  %v1229_v28 = vadd.f32 %v3068_v49, %v1180_v2  ;;  %v1286_v38 = vpack.c.bf16 %v1268_v46, %v1266_v39 }
 0x229   :  { %v1496_v37 = vpop.f32.mrf.mxu0  ;;  %v1281_v63 = vpack.c.bf16 %v1259_v7, %v1257_v15 }
 0x22a   :  { %v1239_v61 = vadd.f32 %v1238_v60, %v1190_v8  ;;  %v1497_v32 = vadd.f32 %v1496_v37, %v3092_v4  ;;  %v1545_v42 = vpop.f32.mrf.mxu1  ;;  %1738 = vmatpush.bf16.xpose.msra.mxu0 %v1287_v0  ;;  %v1227_v8 = vadd.f32 %v3054_v1, %v1178_v18  ;;  %v1283_v60 = vpack.c.bf16 %v1263_v45, %v1261_v36 }
 0x22b   :  { %v1264_v49 = vmax.f32 %v1229_v28, 0.0 }
 0x22c   :  { %v1272_v52 = vmax.f32 %v1239_v61, 0.0  ;;  %v1546_v58 = vadd.f32 %v1545_v42, %v1497_v32  ;;  %v1262_v42 = vmax.f32 %v1227_v8, 0.0 }
 0x22e   :  { %v1288_v5 = vpack.c.bf16 %v1272_v52, %v1270_v35  ;;  %v1683_v16 = vmax.f32 %v1546_v58, 0.0  ;;  %v1224_v35 = vadd.f32 %v3040_v24, %v1175_v40  ;;  %v1284_v52 = vpack.c.bf16 %v1264_v49, %v1262_v42 }
 0x22f   :  { %v1594_v6 = vpop.f32.mrf.mxu2 }
 0x230   :  { %v1595_v33 = vadd.f32 %v1594_v6, %v3100_v12  ;;  %v1643_v50 = vpop.f32.mrf.mxu3  ;;  %1751 = vmatpush.bf16.xpose.msra.mxu1 %v1288_v5  ;;  %v1260_v5 = vmax.f32 %v1224_v35, 0.0 }
 0x231   :  { %v1498_v21 = vpop.f32.mrf.mxu0 }
 0x232   :  { %v1644_v29 = vadd.f32 %v1643_v50, %v1595_v33  ;;  %v1499_v17 = vadd.f32 %v1498_v21, %v3092_v4  ;;  %v1547_v10 = vpop.f32.mrf.mxu1  ;;  %1739 = vmatpush.bf16.xpose.msra.mxu0 %v1285_v9  ;;  %v1282_v50 = vpack.c.bf16 %v1260_v5, %v1258_v13 }
 0x234   :  { %v1548_v14 = vadd.f32 %v1547_v10, %v1499_v17  ;;  %v1684_v1 = vmax.f32 %v1644_v29, 0.0 }
 0x236   :  { %v1685_v41 = vmax.f32 %v1548_v14, 0.0 }
 0x237   :  { %v1596_v0 = vpop.f32.mrf.mxu2 }
 0x238   :  { %v3118_v37 = vpack.c.bf16 %v1685_v41, %v1683_v16  ;;  %v1597_v25 = vadd.f32 %v1596_v0, %v3100_v12  ;;  %v1645_v55 = vpop.f32.mrf.mxu3  ;;  %1752 = vmatpush.bf16.xpose.msra.mxu1 %v1286_v38 }
 0x239   :  { %v1501_v57 = vpop.f32.mrf.mxu0 }
 0x23a   :  { %v1646_v59 = vadd.f32 %v1645_v55, %v1597_v25  ;;  %v1502_v61 = vadd.f32 %v1501_v57, %v3092_v4  ;;  %v1550_v32 = vpop.f32.mrf.mxu1  ;;  %1740 = vmatpush.bf16.xpose.msra.mxu0 %v1283_v60 }
 0x23c   :  { %v1686_v56 = vmax.f32 %v1646_v59, 0.0  ;;  %v1551_v19 = vadd.f32 %v1550_v32, %v1502_v61 }
 0x23e   :  { %v3126_v58 = vpack.c.bf16 %v1686_v56, %v1684_v1  ;;  %v1687_v24 = vmax.f32 %v1551_v19, 0.0 }
 0x23f   :  { %v1599_v43 = vpop.f32.mrf.mxu2 }
 0x240   :  { %v1600_v27 = vadd.f32 %v1599_v43, %v3100_v12  ;;  %v1648_v26 = vpop.f32.mrf.mxu3  ;;  %1753 = vmatpush.bf16.xpose.msra.mxu1 %v1284_v52 }
 0x241   :  { %v1503_v53 = vpop.f32.mrf.mxu0 }
 0x242   :  { %v1649_v6 = vadd.f32 %v1648_v26, %v1600_v27  ;;  %v1504_v11 = vadd.f32 %v1503_v53, %v3092_v4  ;;  %v1552_v47 = vpop.f32.mrf.mxu1  ;;  %1741 = vmatpush.bf16.xpose.msra.mxu0 %v1281_v63 }
 0x244   :  { %v1553_v9 = vadd.f32 %v1552_v47, %v1504_v11  ;;  %v1688_v18 = vmax.f32 %v1649_v6, 0.0 }
 0x246   :  { %v1689_v33 = vmax.f32 %v1553_v9, 0.0 }
 0x247   :  { %v1601_v31 = vpop.f32.mrf.mxu2 }
 0x248   :  { %v3131_v21 = vpack.c.bf16 %v1689_v33, %v1687_v24  ;;  %v1602_v2 = vadd.f32 %v1601_v31, %v3100_v12  ;;  %v1650_v46 = vpop.f32.mrf.mxu3  ;;  %1754 = vmatpush.bf16.xpose.msra.mxu1 %v1282_v50  ;;  %v3269_v50 = vld [vmem:[#allocation17_spill] sm:$0xff] }
 0x249   :  { %v1506_v29 = vpop.f32.mrf.mxu0 }
 0x24a   :  { %v1651_v17 = vadd.f32 %v1650_v46, %v1602_v2  ;;  %v1507_v10 = vadd.f32 %v1506_v29, %v3092_v4  ;;  %v1555_v48 = vpop.f32.mrf.mxu1  ;;  %1742 = vmatpush.bf16.xpose.msra.mxu0 %v3012_v62 }
 0x24c   :  { %v1690_v20 = vmax.f32 %v1651_v17, 0.0  ;;  %v1556_v45 = vadd.f32 %v1555_v48, %v1507_v10 }
 0x24e   :  { %v3136_v39 = vpack.c.bf16 %v1690_v20, %v1688_v18  ;;  %v1691_v62 = vmax.f32 %v1556_v45, 0.0 }
 0x24f   :  { %v1604_v14 = vpop.f32.mrf.mxu2 }
 0x250   :  { %v1605_v36 = vadd.f32 %v1604_v14, %v3100_v12  ;;  %v1653_v28 = vpop.f32.mrf.mxu3  ;;  %1755 = vmatpush.bf16.xpose.msra.mxu1 %v3019_v23 }
 0x251   :  { %v1508_v38 = vpop.f32.mrf.mxu0 }
 0x252   :  { %v1654_v16 = vadd.f32 %v1653_v28, %v1605_v36  ;;  %v1509_v41 = vadd.f32 %v1508_v38, %v3092_v4  ;;  %v1557_v3 = vpop.f32.mrf.mxu1  ;;  %1743 = vmatpush.bf16.xpose.msra.mxu0 %v2992_v44 }
 0x254   :  { %v1558_v0 = vadd.f32 %v1557_v3, %v1509_v41  ;;  %v1692_v61 = vmax.f32 %v1654_v16, 0.0 }
 0x256   :  { %v1693_v8 = vmax.f32 %v1558_v0, 0.0 }
 0x257   :  { %v1606_v60 = vpop.f32.mrf.mxu2 }
 0x258   :  { %v3142_v25 = vpack.c.bf16 %v1693_v8, %v1691_v62  ;;  %v1607_v55 = vadd.f32 %v1606_v60, %v3100_v12  ;;  %v1655_v57 = vpop.f32.mrf.mxu3  ;;  %1756 = vmatpush.bf16.xpose.msra.mxu1 %v2997_v30 }
 0x259   :  { %v1511_v40 = vpop.f32.mrf.mxu0 }
 0x25a   :  { %v1656_v23 = vadd.f32 %v1655_v57, %v1607_v55  ;;  %v1512_v49 = vadd.f32 %v1511_v40, %v3092_v4  ;;  %v1560_v59 = vpop.f32.mrf.mxu1  ;;  %1744 = vmatpush.bf16.xpose.msra.mxu0 %v2972_v54 }
 0x25c   :  { %v1694_v44 = vmax.f32 %v1656_v23, 0.0  ;;  %v1561_v32 = vadd.f32 %v1560_v59, %v1512_v49 }
 0x25e   :  { %v3148_v7 = vpack.c.bf16 %v1694_v44, %v1692_v61  ;;  %v1695_v54 = vmax.f32 %v1561_v32, 0.0 }
 0x25f   :  { %v1609_v42 = vpop.f32.mrf.mxu2 }
 0x260   :  { %v1610_v1 = vadd.f32 %v1609_v42, %v3100_v12  ;;  %v1658_v56 = vpop.f32.mrf.mxu3  ;;  %1757 = vmatpush.bf16.xpose.msra.mxu1 %v2977_v22  ;;  %v3268_v22 = vld [vmem:[#allocation16_spill] sm:$0xff] }
 0x261   :  { %v1513_v19 = vpop.f32.mrf.mxu0 }
 0x262   :  { %v1659_v30 = vadd.f32 %v1658_v56, %v1610_v1  ;;  %v1514_v15 = vadd.f32 %v1513_v19, %v3092_v4  ;;  %v1562_v35 = vpop.f32.mrf.mxu1  ;;  %1745 = vmatpush.bf16.xpose.msra.mxu0 %v2952_v51 }
 0x264   :  { %v1563_v52 = vadd.f32 %v1562_v35, %v1514_v15  ;;  %v1696_v13 = vmax.f32 %v1659_v30, 0.0 }
 0x266   :  { %v1697_v43 = vmax.f32 %v1563_v52, 0.0 }
 0x267   :  { %v1611_v27 = vpop.f32.mrf.mxu2 }
 0x268   :  { %v3154_v26 = vpack.c.bf16 %v1697_v43, %v1695_v54  ;;  %v1612_v63 = vadd.f32 %v1611_v27, %v3100_v12  ;;  %v1660_v53 = vpop.f32.mrf.mxu3  ;;  %1758 = vmatpush.bf16.xpose.msra.mxu1 %v2957_v34 }
 0x269   :  { %v1516_v5 = vpop.f32.mrf.mxu0  ;;  %1746 = vmatmul.bf16.vlgmr.msra.gmra.mxu0 %v3268_v22 }
 0x26a   :  { %v1661_v6 = vadd.f32 %v1660_v53, %v1612_v63  ;;  %v1517_v11 = vadd.f32 %v1516_v5, %v3092_v4  ;;  %v1565_v47 = vpop.f32.mrf.mxu1 }
 0x26c   :  { %v1698_v51 = vmax.f32 %v1661_v6, 0.0  ;;  %v1566_v9 = vadd.f32 %v1565_v47, %v1517_v11 }
 0x26e   :  { %v3160_v24 = vpack.c.bf16 %v1698_v51, %v1696_v13  ;;  %v1699_v48 = vmax.f32 %v1566_v9, 0.0 }
 0x26f   :  { %v1614_v33 = vpop.f32.mrf.mxu2  ;;  %1759 = vmatmul.bf16.vlgmr.msra.gmra.mxu1 %v3269_v50 }
 0x270   :  { %v1615_v31 = vadd.f32 %v1614_v33, %v3100_v12  ;;  %v1663_v2 = vpop.f32.mrf.mxu3 }
 0x271   :  { %v1518_v46 = vpop.f32.mrf.mxu0 }
 0x272   :  { %v1664_v34 = vadd.f32 %v1663_v2, %v1615_v31  ;;  %v1519_v29 = vadd.f32 %v1518_v46, %v3092_v4  ;;  %v1567_v17 = vpop.f32.mrf.mxu1 }
 0x274   :  { %v1568_v10 = vadd.f32 %v1567_v17, %v1519_v29  ;;  %v1700_v41 = vmax.f32 %v1664_v34, 0.0 }
 0x276   :  { %v1701_v18 = vmax.f32 %v1568_v10, 0.0 }
 0x277   :  { %v1616_v20 = vpop.f32.mrf.mxu2 }
 0x278   :  { %v3165_v45 = vpack.c.bf16 %v1701_v18, %v1699_v48  ;;  %v1617_v14 = vadd.f32 %v1616_v20, %v3100_v12  ;;  %v1665_v36 = vpop.f32.mrf.mxu3 }
 0x279   :  { %v1521_v28 = vpop.f32.mrf.mxu0 }
 0x27a   :  { %v1666_v38 = vadd.f32 %v1665_v36, %v1617_v14  ;;  %v1570_v16 = vpop.f32.mrf.mxu1  ;;  %v1522_v18 = vadd.f32 %v1521_v28, %v3092_v4 }
 0x27c   :  { %v1702_v3 = vmax.f32 %v1666_v38, 0.0 }
 0x27e   :  { %v3168_v0 = vpack.c.bf16 %v1702_v3, %v1700_v41 }
 0x27f   :  { %v1619_v62 = vpop.f32.mrf.mxu2 }
 0x280   :  { %v1668_v8 = vpop.f32.mrf.mxu3 }
 0x281   :  { %v1523_v60 = vpop.f32.mrf.mxu0 }
 0x282   :  { %v1572_v55 = vpop.f32.mrf.mxu1  ;;  %v1524_v34 = vadd.f32 %v1523_v60, %v3092_v4  ;;  %v1620_v60 = vadd.f32 %v1619_v62, %v3100_v12  ;;  %v1804_v62 = vld [vmem:[#allocation3] sm:$0x1] }
 0x284   :  { %v1573_v38 = vadd.f32 %v1572_v55, %v1524_v34 }
 0x287   :  { %v1621_v57 = vpop.f32.mrf.mxu2 }
 0x288   :  { %v1670_v40 = vpop.f32.mrf.mxu3 }
 0x289   :  { %v1526_v23 = vpop.f32.mrf.mxu0 }
 0x28a   :  { %v1575_v49 = vpop.f32.mrf.mxu1  ;;  %v1527_v22 = vadd.f32 %v1526_v23, %v3092_v4  ;;  %v1571_v23 = vadd.f32 %v1570_v16, %v1522_v18  ;;  %v2427_v16 = vmov 0  }
 0x28b   :  { %2318 = vset.pattern.permute.xlu0 %v2427_v16 }
 0x28c   :  { %v1576_v31 = vadd.f32 %v1575_v49, %v1527_v22  ;;  %v1622_v49 = vadd.f32 %v1621_v57, %v3100_v12 }
 0x28e   :  { %v1707_v20 = vmax.f32 %v1576_v31, 0.0 }
 0x28f   :  { %v1624_v59 = vpop.f32.mrf.mxu2 }
 0x290   :  { %v1673_v61 = vpop.f32.mrf.mxu3  ;;  %v1625_v29 = vadd.f32 %v1624_v59, %v3100_v12  ;;  %v1705_v59 = vmax.f32 %v1573_v38, 0.0 }
 0x291   :  { %v1528_v44 = vpop.f32.mrf.mxu0 }
 0x292   :  { %v1577_v32 = vpop.f32.mrf.mxu1  ;;  %v1529_v63 = vadd.f32 %v1528_v44, %v3092_v4  ;;  %v1674_v41 = vadd.f32 %v1673_v61, %v1625_v29 }
 0x294   :  { %v1578_v13 = vadd.f32 %v1577_v32, %v1529_v63  ;;  %v1708_v32 = vmax.f32 %v1674_v41, 0.0 }
 0x296   :  { %v1709_v17 = vmax.f32 %v1578_v13, 0.0 }
 0x297   :  { %v1626_v42 = vpop.f32.mrf.mxu2 }
 0x298   :  { %v1675_v1 = vpop.f32.mrf.mxu3  ;;  %v1627_v2 = vadd.f32 %v1626_v42, %v3100_v12  ;;  %v1727_v3 = vpack.c.bf16 %v1709_v17, %v1707_v20  ;;  %v1703_v42 = vmax.f32 %v1571_v23, 0.0 }
 0x299   :  { %v1531_v56 = vpop.f32.mrf.mxu0 }
 0x29a   :  { %v1580_v19 = vpop.f32.mrf.mxu1  ;;  %v1532_v30 = vadd.f32 %v1531_v56, %v3092_v4  ;;  %v1676_v14 = vadd.f32 %v1675_v1, %v1627_v2  ;;  %v1671_v56 = vadd.f32 %v1670_v40, %v1622_v49  ;;  %v1725_v28 = vpack.c.bf16 %v1705_v59, %v1703_v42 }
 0x29c   :  { %v1581_v54 = vadd.f32 %v1580_v19, %v1532_v30  ;;  %v1710_v44 = vmax.f32 %v1676_v14, 0.0  ;;  %v1706_v1 = vmax.f32 %v1671_v56, 0.0 }
 0x29e   :  { %v1711_v6 = vmax.f32 %v1581_v54, 0.0  ;;  %v1728_v19 = vpack.c.bf16 %v1710_v44, %v1708_v32 }
 0x29f   :  { %v1629_v15 = vpop.f32.mrf.mxu2 }
 0x2a0   :  { %v1678_v35 = vpop.f32.mrf.mxu3  ;;  %v1630_v53 = vadd.f32 %v1629_v15, %v3100_v12 }
 0x2a1   :  { %v1533_v52 = vpop.f32.mrf.mxu0 }
 0x2a2   :  { %v1534_v43 = vadd.f32 %v1533_v52, %v3092_v4  ;;  %v1582_v27 = vpop.f32.mrf.mxu1  ;;  %v1679_v51 = vadd.f32 %v1678_v35, %v1630_v53  ;;  %v1669_v4 = vadd.f32 %v1668_v8, %v1620_v60 }
 0x2a4   :  { %v1583_v5 = vadd.f32 %v1582_v27, %v1534_v43  ;;  %v1712_v10 = vmax.f32 %v1679_v51, 0.0  ;;  %v1704_v55 = vmax.f32 %v1669_v4, 0.0 }
 0x2a6   :  { %v1713_v11 = vmax.f32 %v1583_v5, 0.0  ;;  %v1726_v61 = vpack.c.bf16 %v1706_v1, %v1704_v55 }
 0x2a7   :  { %v1631_v47 = vpop.f32.mrf.mxu2 }
 0x2a8   :  { %v1729_v9 = vpack.c.bf16 %v1713_v11, %v1711_v6  ;;  %v1632_v33 = vadd.f32 %v1631_v47, %v3100_v12  ;;  %v1680_v50 = vpop.f32.mrf.mxu3  ;;  %v1795_v12 = vld [vmem:[#allocation2] sm:$0x1] }
 0x2a9   :  { %1798 = vperm.xlu0 %2318, %v1795_v12  }
 0x2aa   :  { %v1681_v46 = vadd.f32 %v1680_v50, %v1632_v33  ;;  %1769 = vmatpush.bf16.xpose.msra.mxu2 %v1729_v9 }
 0x2ac   :  { %v1714_v48 = vmax.f32 %v1681_v46, 0.0 }
 0x2ae   :  { %v1730_v36 = vpack.c.bf16 %v1714_v48, %v1712_v10 }
 0x2b0   :  { %1782 = vmatpush.bf16.xpose.msra.mxu3 %v1730_v36 }
 0x2b1   :  { %1807 = vperm.xlu0 %2318, %v1804_v62  }
 0x2b2   :  { %1770 = vmatpush.bf16.xpose.msra.mxu2 %v1727_v3 }
 0x2b8   :  { %1783 = vmatpush.bf16.xpose.msra.mxu3 %v1728_v19 }
 0x2ba   :  { %1771 = vmatpush.bf16.xpose.msra.mxu2 %v1725_v28 }
 0x2c0   :  { %1784 = vmatpush.bf16.xpose.msra.mxu3 %v1726_v61 }
 0x2c2   :  { %1772 = vmatpush.bf16.xpose.msra.mxu2 %v3165_v45  ;;  %v1765_v45 = vld [vmem:[#allocation1] sm:$0xff] }
 0x2c8   :  { %1785 = vmatpush.bf16.xpose.msra.mxu3 %v3168_v0 }
 0x2ca   :  { %1773 = vmatpush.bf16.xpose.msra.mxu2 %v3154_v26  ;;  %v1766_v26 = vld [vmem:[#allocation1 + $0x9] sm:$0xff] }
 0x2d0   :  { %1786 = vmatpush.bf16.xpose.msra.mxu3 %v3160_v24 }
 0x2d2   :  { %1774 = vmatpush.bf16.xpose.msra.mxu2 %v3142_v25 }
 0x2d8   :  { %1787 = vmatpush.bf16.xpose.msra.mxu3 %v3148_v7 }
 0x2da   :  { %1775 = vmatpush.bf16.xpose.msra.mxu2 %v3131_v21 }
 0x2e0   :  { %1788 = vmatpush.bf16.xpose.msra.mxu3 %v3136_v39 }
 0x2e2   :  { %1776 = vmatpush.bf16.xpose.msra.mxu2 %v3118_v37 }
 0x2e6   :  { %v1747_v24 = vpop.f32.mrf.mxu0 }
 0x2e8   :  { %1789 = vmatpush.bf16.xpose.msra.mxu3 %v3126_v58 }
 0x2e9   :  { %1777 = vmatmul.bf16.vlgmr.msra.gmra.mxu2 %v1765_v45 }
 0x2ec   :  { %v1760_v0 = vpop.f32.mrf.mxu1 }
 0x2ed   :  { %v1761_v57 = vadd.f32 %v1760_v0, %v1747_v24 }
 0x2ee   :  { %v1749_v8 = vpop.f32.mrf.mxu0 }
 0x2ef   :  { %1790 = vmatmul.bf16.vlgmr.msra.gmra.mxu3 %v1766_v26 }
 0x2f4   :  { %v1762_v25 = vpop.f32.mrf.mxu1 }
 0x31b   :  { %v1799_v40 = vpop.permute.xlu0 %1798 }
 0x31c   :  { %v1801_v21 = vperm.slane %v1799_v40, 0 }
 0x31e   :  { %v1802_v37 = vadd.f32 %v1801_v21, %v1761_v57 }
 0x320   :  { %1803 = vst [vmem:[#allocation9] sm:$0x1] %v1802_v37 }
 0x321   :  { %1823 = dma.vmem_to_hbm [thread:$0]  %s1819_s10, 16, %s1821_s11, [#allocation6]  }
 0x323   :  { %v1808_v39 = vpop.permute.xlu0 %1807 }
 0x324   :  { %v1810_v15 = vperm.slane %v1808_v39, 0 }
 0x36c   :  { %v1778_v58 = vpop.f32.mrf.mxu2 }
 0x372   :  { %v1791_v7 = vpop.f32.mrf.mxu3 }
 0x373   :  { %v1792_v30 = vadd.f32 %v1791_v7, %v1778_v58 }
 0x374   :  { %v1780_v35 = vpop.f32.mrf.mxu2 }
 0x375   :  { %v1811_v52 = vadd.f32 %v1810_v15, %v1792_v30 }
 0x377   :  { %1812 = vst [vmem:[#allocation10 - $0x1] sm:$0x2] %v1811_v52 }
 0x378   :  { %1834 = dma.vmem_to_hbm [thread:$0]  %s1830_s21, 16, %s1832_s1, [#allocation11]  }
 0x37a   :  { %v1793_v54 = vpop.f32.mrf.mxu3 }
 0x37b   :  { %2419 = dma.done.wait [#allocation6], 16  }
 0x37c   :  { %2420 = vsyncadd [#allocation6], 4294967280 }
 0x37d   :  { %2421 = dma.done.wait [#allocation11], 16  }
 0x37e   :  { %2422 = vsyncadd [#allocation11], 4294967280 }
 0x37f   :  { %1843 = vsyncpa [#allocation5], 1 }
 0x380   :  { %1844 = vsyncpa [#allocation8], 1 }
 0x381   :  { %1845 = vsyncpa [#allocation6], 1 }
 0x382   :  { %1846 = vsyncpa [#allocation11], 1 }

</bundles_post_ra>
